<compile_context>
chip_gen: v6e
topology: v6e:2x2x1
jax: 0.10.0
libtpu: 0.0.40
codegen_flags: <defaults>
</compile_context>

<pallas_src>
import functools

import jax
import jax.numpy as jnp
from jax import lax
from jax.experimental import pallas as pl
from jax.experimental.pallas import tpu as pltpu


# ----------------------------------------------------------------------------
# Pallas kernel (one grid step == one tile of Ts timesteps, both directions)
# ----------------------------------------------------------------------------
def _encoder_kernel(
    # inputs
    emb_f_ref, emb_b_ref,                        # [Ts, Bp, E] (fwd / time-reversed bwd tile views)
    wih_f_ref, whh_f_ref, bi_f_ref, bhn_f_ref,   # [E,3H], [H,3H], [1,3H], [1,H]
    wih_b_ref, whh_b_ref, bi_b_ref, bhn_b_ref,
    wfc_f_ref, wfc_b_ref, bfc_ref,               # [H,D], [H,D], [1,D]
    # outputs
    out_f_ref, out_b_ref, hid_ref,               # [Ts,Bp,H], [Ts,Bp,H], [Bp,D]
    # scratch
    h_f_ref, h_b_ref,                            # [Bp,H] f32 carried hidden states
    gi_f_ref, gi_b_ref,                          # [Ts,Bp,3H] per-tile input projections
    *, S, Sp, Ts, H, mask_pad):
    g = pl.program_id(0)
    n_tiles = pl.num_programs(0)
    _, Bp, E = emb_f_ref.shape
    mxu_dtype = whh_f_ref.dtype

    # ---- first grid step: zero the carried hidden states ---------------------
    @pl.when(g == 0)
    def _():
        h_f_ref[...] = jnp.zeros_like(h_f_ref)
        h_b_ref[...] = jnp.zeros_like(h_b_ref)

    # ---- Phase 1 (per tile): fused input projection, ONE MXU dot per dir -----
    # [Ts*Bp, E] @ [E, 3H]; gates r|z|n packed along lanes -> lane-dense store.
    # b_ih + b_hh folded for r/z; b_in folded; b_hn kept separate (see gru_cell).
    def project(emb_ref, wih_ref, bi_ref, gi_ref):
        x = emb_ref[...].reshape(Ts * Bp, E).astype(mxu_dtype)
        gi = jnp.dot(x, wih_ref[...], preferred_element_type=jnp.float32) + bi_ref[...]
        gi_ref[...] = gi.reshape(Ts, Bp, 3 * H).astype(gi_ref.dtype)

    project(emb_f_ref, wih_f_ref, bi_f_ref, gi_f_ref)
    project(emb_b_ref, wih_b_ref, bi_b_ref, gi_b_ref)

    bhn_f = bhn_f_ref[...]          # [1, H]
    bhn_b = bhn_b_ref[...]

    def gru_cell(h, gi, whh_ref, bhn):
        # Single fused [Bp,H] @ [H,3H] recurrent dot; weights stream from the
        # VMEM ref (not hoisted values).  Gate math / carry stay in f32.
        gh = jnp.dot(h.astype(mxu_dtype), whh_ref[...],
                     preferred_element_type=jnp.float32)
        r = jax.nn.sigmoid(gi[:, 0:H] + gh[:, 0:H])
        z = jax.nn.sigmoid(gi[:, H:2 * H] + gh[:, H:2 * H])
        n = jnp.tanh(gi[:, 2 * H:3 * H] + r * (gh[:, 2 * H:3 * H] + bhn))
        return (1.0 - z) * n + z * h

    # ---- Phase 2: interleaved fwd/bwd recurrence over the tile ---------------
    def body(i, carry):
        h_f, h_b = carry
        ib = Ts - 1 - i                       # bwd local index (tile is time-reversed)
        hf_new = gru_cell(h_f, gi_f_ref[i], whh_f_ref, bhn_f)
        hb_new = gru_cell(h_b, gi_b_ref[ib], whh_b_ref, bhn_b)
        if mask_pad:
            step = g * Ts + i                 # global processing step (0 .. Sp-1)
            hf_new = jnp.where(step < S, hf_new, h_f)        # fwd pad at the end
            hb_new = jnp.where(step >= Sp - S, hb_new, h_b)  # bwd pad processed first
        out_f_ref[i] = hf_new
        out_b_ref[ib] = hb_new
        return (hf_new, hb_new)

    h_f, h_b = lax.fori_loop(0, Ts, body, (h_f_ref[...], h_b_ref[...]),
                             unroll=min(Ts, 8))
    h_f_ref[...] = h_f
    h_b_ref[...] = h_b

    # ---- Phase 3 (last tile): hidden = tanh(fc(cat(h_fwd, h_bwd))) -----------
    @pl.when(g == n_tiles - 1)
    def _():
        hid_ref[...] = jnp.tanh(
            jnp.dot(h_f.astype(mxu_dtype), wfc_f_ref[...],
                    preferred_element_type=jnp.float32)
            + jnp.dot(h_b.astype(mxu_dtype), wfc_b_ref[...],
                      preferred_element_type=jnp.float32)
            + bfc_ref[...])


# ----------------------------------------------------------------------------
# Wrapper
# ----------------------------------------------------------------------------
@functools.partial(jax.jit, static_argnames=("ts", "mxu_dtype"))
def encoder_forward(src, params, *, ts=8, mxu_dtype=jnp.float32):
    """src: [S, B] int32.  Returns (outputs [S, B, 2H], hidden [B, D])."""
    emb_table = params["embedding"]                       # [V, E]
    # Embedding gather + inference-mode dropout (identity): plain XLA glue.
    embedded = jnp.take(emb_table, src, axis=0).astype(jnp.float32)  # [S, B, E]

    S, B, E = embedded.shape
    H = params["whh_f"].shape[0]
    D = params["wfc"].shape[1]
    H3 = 3 * H

    # Pad batch to a full 8-sublane tile; pad S to a multiple of the S-tile.
    Bp = ((B + 7) // 8) * 8
    Ts = max(1, min(ts, S))
    nT = -(-S // Ts)
    Sp = nT * Ts
    mask_pad = (Sp != S)
    emb_p = jnp.pad(embedded, ((0, Sp - S), (0, Bp - B), (0, 0)))

    # ---- weight re-layout: fused [in, 3H] stacks (gate order r, z, n) --------
    def fuse_bias(bih, bhh):
        # b_ih + b_hh folded for r/z; b_in kept as-is; b_hn separate because
        # n = tanh(i_n + b_in + r * (h @ W_hn + b_hn)).
        bi = jnp.concatenate([bih[:, :2 * H] + bhh[:, :2 * H], bih[:, 2 * H:]], axis=1)
        return bi, bhh[:, 2 * H:]

    bi_f, bhn_f = fuse_bias(params["bih_f"], params["bhh_f"])
    bi_b, bhn_b = fuse_bias(params["bih_b"], params["bhh_b"])
    wih_f = params["wih_f"].astype(mxu_dtype)             # [E, 3H]
    whh_f = params["whh_f"].astype(mxu_dtype)             # [H, 3H]
    wih_b = params["wih_b"].astype(mxu_dtype)
    whh_b = params["whh_b"].astype(mxu_dtype)
    wfc_f = params["wfc"][:H, :].astype(mxu_dtype)        # [H, D]
    wfc_b = params["wfc"][H:, :].astype(mxu_dtype)
    bfc = params["bfc"]

    kernel = functools.partial(_encoder_kernel, S=S, Sp=Sp, Ts=Ts, H=H,
                               mask_pad=mask_pad)

    # Full-array (constant index) blocks for weights; tiled blocks for emb/out.
    def w_spec(shape):
        return pl.BlockSpec(shape, lambda g: (0, 0))

    emb_f_spec = pl.BlockSpec((Ts, Bp, E), lambda g: (g, 0, 0))
    emb_b_spec = pl.BlockSpec((Ts, Bp, E), lambda g: (nT - 1 - g, 0, 0))
    out_f_spec = pl.BlockSpec((Ts, Bp, H), lambda g: (g, 0, 0))
    out_b_spec = pl.BlockSpec((Ts, Bp, H), lambda g: (nT - 1 - g, 0, 0))
    hid_spec = pl.BlockSpec((Bp, D), lambda g: (0, 0))

    # TODO(synk): on v7x, split the fwd/bwd directions across the two TensorCores
    # (leading size-2 grid axis with core-parallel semantics) instead of
    # interleaving them on one core.
    out_f, out_b, hid = pl.pallas_call(
        kernel,
        grid=(nT,),
        out_shape=(
            jax.ShapeDtypeStruct((Sp, Bp, H), jnp.float32),   # fwd hidden per step
            jax.ShapeDtypeStruct((Sp, Bp, H), jnp.float32),   # bwd hidden per step
            jax.ShapeDtypeStruct((Bp, D), jnp.float32),       # final hidden
        ),
        in_specs=[
            emb_f_spec, emb_b_spec,
            w_spec((E, H3)), w_spec((H, H3)), w_spec((1, H3)), w_spec((1, H)),
            w_spec((E, H3)), w_spec((H, H3)), w_spec((1, H3)), w_spec((1, H)),
            w_spec((H, D)), w_spec((H, D)), w_spec((1, D)),
        ],
        out_specs=(out_f_spec, out_b_spec, hid_spec),
        scratch_shapes=[
            pltpu.VMEM((Bp, H), jnp.float32),        # carried h_fwd
            pltpu.VMEM((Bp, H), jnp.float32),        # carried h_bwd
            pltpu.VMEM((Ts, Bp, H3), mxu_dtype),     # fused input projection, fwd tile
            pltpu.VMEM((Ts, Bp, H3), mxu_dtype),     # fused input projection, bwd tile
        ],
        compiler_params=pltpu.CompilerParams(
            dimension_semantics=("arbitrary",),      # carried state -> sequential grid
            vmem_limit_bytes=48 * 1024 * 1024,       # explicit budget (< v7x 64 MiB/TC)
        ),
    )(emb_p, emb_p,
      wih_f, whh_f, bi_f, bhn_f,
      wih_b, whh_b, bi_b, bhn_b,
      wfc_f, wfc_b, bfc)

    # TODO(synk): when H % 128 == 0, emit a single lane-dense [Sp, Bp, 2H] slab
    # from the kernel; with S-tiling the fwd/bwd chains write opposite S-tiles
    # in the same grid step, which currently forces two slabs + this concat.
    outputs = jnp.concatenate([out_f[:S, :B, :], out_b[:S, :B, :]], axis=-1)
    hidden = hid[:B, :]
    return outputs, hidden


# ----------------------------------------------------------------------------
# Pure-JAX reference (same math as torch.nn.GRU + Linear) for validation
# ----------------------------------------------------------------------------
def encoder_reference(src, params):
    emb = jnp.take(params["embedding"], src, axis=0).astype(jnp.float32)
    S, B, E = emb.shape
    H = params["whh_f"].shape[0]

    def gru_step(x, h, wih, whh, bih, bhh):
        gi = x @ wih + bih
        gh = h @ whh + bhh
        i_r, i_z, i_n = gi[:, :H], gi[:, H:2 * H], gi[:, 2 * H:]
        h_r, h_z, h_n = gh[:, :H], gh[:, H:2 * H], gh[:, 2 * H:]
        r = jax.nn.sigmoid(i_r + h_r)
        z = jax.nn.sigmoid(i_z + h_z)
        n = jnp.tanh(i_n + r * h_n)
        return (1.0 - z) * n + z * h

    h = jnp.zeros((B, H), jnp.float32)
    fwd_outs = []
    for t in range(S):
        h = gru_step(emb[t], h, params["wih_f"], params["whh_f"],
                     params["bih_f"], params["bhh_f"])
        fwd_outs.append(h)
    h_fwd = h

    h = jnp.zeros((B, H), jnp.float32)
    bwd_outs = [None] * S
    for t in range(S - 1, -1, -1):
        h = gru_step(emb[t], h, params["wih_b"], params["whh_b"],
                     params["bih_b"], params["bhh_b"])
        bwd_outs[t] = h
    h_bwd = h

    outputs = jnp.concatenate(
        [jnp.stack(fwd_outs, axis=0), jnp.stack(bwd_outs, axis=0)], axis=-1)
    hidden = jnp.tanh(
        jnp.concatenate([h_fwd, h_bwd], axis=1) @ params["wfc"] + params["bfc"])
    return outputs, hidden


# ----------------------------------------------------------------------------
# Deterministic parameter initialization (shapes from Encoder.__init__)
# ----------------------------------------------------------------------------
def init_params(key, input_dim, emb_dim, enc_hid_dim, dec_hid_dim):
    ks = jax.random.split(key, 12)
    H, E, D, V = enc_hid_dim, emb_dim, dec_hid_dim, input_dim
    u = lambda k, shape, s: jax.random.uniform(k, shape, jnp.float32, -s, s)
    bound = 1.0 / jnp.sqrt(H)
    return {
        "embedding": jax.random.normal(ks[0], (V, E), jnp.float32) * 0.1,
        # GRU weights stored transposed ([in, 3H], gate order r|z|n) so math is x @ W.
        "wih_f": u(ks[1], (E, 3 * H), bound),
        "whh_f": u(ks[2], (H, 3 * H), bound),
        "bih_f": u(ks[3], (1, 3 * H), bound),
        "bhh_f": u(ks[4], (1, 3 * H), bound),
        "wih_b": u(ks[5], (E, 3 * H), bound),
        "whh_b": u(ks[6], (H, 3 * H), bound),
        "bih_b": u(ks[7], (1, 3 * H), bound),
        "bhh_b": u(ks[8], (1, 3 * H), bound),
        "wfc": u(ks[9], (2 * H, D), 1.0 / jnp.sqrt(2 * H)),
        "bfc": u(ks[10], (1, D), 1.0 / jnp.sqrt(2 * H)),
    }


if __name__ == "__main__":
    V, E, H, D = 50, 32, 32, 32

    def check(key, S, B, ts, mxu_dtype, tol):
        k_param, k_src = jax.random.split(key)
        params = init_params(k_param, V, E, H, D)
        src = jax.random.randint(k_src, (S, B), 0, V, dtype=jnp.int32)
        outputs, hidden = encoder_forward(src, params, ts=ts, mxu_dtype=mxu_dtype)
        jax.block_until_ready((outputs, hidden))
        ref_outputs, ref_hidden = encoder_reference(src, params)
        assert outputs.shape == (S, B, 2 * H)
        assert hidden.shape == (B, D)
        assert jnp.allclose(outputs, ref_outputs, atol=tol, rtol=tol)
        assert jnp.allclose(hidden, ref_hidden, atol=tol, rtol=tol)

    key = jax.random.PRNGKey(0)
    k1, k2, k3 = jax.random.split(key, 3)
    # (1) S divisible by the tile: 2 grid steps, carried hidden state.
    check(k1, S=8, B=2, ts=4, mxu_dtype=jnp.float32, tol=1e-4)
    # (2) Ragged S: sequence padding + in-kernel masking path (3 grid steps).
    check(k2, S=10, B=3, ts=4, mxu_dtype=jnp.float32, tol=1e-4)
    # (3) bf16 MXU operands (v6e/v7x feedback); f32 carries/accumulation.
    check(k3, S=8, B=2, ts=4, mxu_dtype=jnp.bfloat16, tol=3e-2)

    print("KERNEL_OK")
</pallas_src>

<mosaic_0001>
module attributes {stable_mosaic.version = 11 : i64} {
  func.func @_encoder_kernel(%arg0: i32, %arg1: memref<4x8x32xf32, #tpu.memory_space<vmem>>, %arg2: memref<4x8x32xf32, #tpu.memory_space<vmem>>, %arg3: memref<32x96xf32, #tpu.memory_space<vmem>>, %arg4: memref<32x96xf32, #tpu.memory_space<vmem>>, %arg5: memref<1x96xf32, #tpu.memory_space<vmem>>, %arg6: memref<1x32xf32, #tpu.memory_space<vmem>>, %arg7: memref<32x96xf32, #tpu.memory_space<vmem>>, %arg8: memref<32x96xf32, #tpu.memory_space<vmem>>, %arg9: memref<1x96xf32, #tpu.memory_space<vmem>>, %arg10: memref<1x32xf32, #tpu.memory_space<vmem>>, %arg11: memref<32x32xf32, #tpu.memory_space<vmem>>, %arg12: memref<32x32xf32, #tpu.memory_space<vmem>>, %arg13: memref<1x32xf32, #tpu.memory_space<vmem>>, %arg14: memref<4x8x32xf32, #tpu.memory_space<vmem>>, %arg15: memref<4x8x32xf32, #tpu.memory_space<vmem>>, %arg16: memref<8x32xf32, #tpu.memory_space<vmem>>, %arg17: memref<8x32xf32, #tpu.memory_space<vmem>>, %arg18: memref<8x32xf32, #tpu.memory_space<vmem>>, %arg19: memref<4x8x96xf32, #tpu.memory_space<vmem>>, %arg20: memref<4x8x96xf32, #tpu.memory_space<vmem>>) attributes {dimension_semantics = [#tpu.dimension_semantics<arbitrary>], iteration_bounds = array<i64: 2>, scalar_prefetch = 0 : i64, scratch_operands = 4 : i64, tpu.core_type = #tpu.core_type<tc>, window_params = [{transform_indices = @transform_0, window_bounds = array<i64: 4, 8, 32>}, {transform_indices = @transform_1, window_bounds = array<i64: 4, 8, 32>}, {pipeline_mode = #tpu.pipeline_mode<synchronous>, transform_indices = @transform_2, window_bounds = array<i64: 32, 96>}, {pipeline_mode = #tpu.pipeline_mode<synchronous>, transform_indices = @transform_3, window_bounds = array<i64: 32, 96>}, {pipeline_mode = #tpu.pipeline_mode<synchronous>, transform_indices = @transform_4, window_bounds = array<i64: 1, 96>}, {pipeline_mode = #tpu.pipeline_mode<synchronous>, transform_indices = @transform_5, window_bounds = array<i64: 1, 32>}, {pipeline_mode = #tpu.pipeline_mode<synchronous>, transform_indices = @transform_6, window_bounds = array<i64: 32, 96>}, {pipeline_mode = #tpu.pipeline_mode<synchronous>, transform_indices = @transform_7, window_bounds = array<i64: 32, 96>}, {pipeline_mode = #tpu.pipeline_mode<synchronous>, transform_indices = @transform_8, window_bounds = array<i64: 1, 96>}, {pipeline_mode = #tpu.pipeline_mode<synchronous>, transform_indices = @transform_9, window_bounds = array<i64: 1, 32>}, {pipeline_mode = #tpu.pipeline_mode<synchronous>, transform_indices = @transform_10, window_bounds = array<i64: 32, 32>}, {pipeline_mode = #tpu.pipeline_mode<synchronous>, transform_indices = @transform_11, window_bounds = array<i64: 32, 32>}, {pipeline_mode = #tpu.pipeline_mode<synchronous>, transform_indices = @transform_12, window_bounds = array<i64: 1, 32>}, {transform_indices = @transform_13, window_bounds = array<i64: 4, 8, 32>}, {transform_indices = @transform_14, window_bounds = array<i64: 4, 8, 32>}, {pipeline_mode = #tpu.pipeline_mode<synchronous>, transform_indices = @transform_15, window_bounds = array<i64: 8, 32>}]} {
    %c0_i32 = arith.constant 0 : i32
    %0 = arith.cmpi eq, %arg0, %c0_i32 : i32
    %1 = arith.extui %0 : i1 to i32
    %c0_i32_0 = arith.constant 0 : i32
    %2 = arith.cmpi ne, %1, %c0_i32_0 : i32
    scf.if %2 {
      %cst_120 = arith.constant 0.000000e+00 : f32
      %330 = vector.broadcast %cst_120 : f32 to vector<8x32xf32>
      %c0_121 = arith.constant 0 : index
      %c0_122 = arith.constant 0 : index
      %331 = vector.load %arg17[%c0_121, %c0_122] : memref<8x32xf32, #tpu.memory_space<vmem>>, vector<8x32xf32>
      tpu.vector_store %arg17[%c0_121, %c0_122], %330 {strides = array<i32>} : memref<8x32xf32, #tpu.memory_space<vmem>>, vector<8x32xf32>,
      %cst_123 = arith.constant 0.000000e+00 : f32
      %332 = vector.broadcast %cst_123 : f32 to vector<8x32xf32>
      %c0_124 = arith.constant 0 : index
      %c0_125 = arith.constant 0 : index
      %333 = vector.load %arg18[%c0_124, %c0_125] : memref<8x32xf32, #tpu.memory_space<vmem>>, vector<8x32xf32>
      tpu.vector_store %arg18[%c0_124, %c0_125], %332 {strides = array<i32>} : memref<8x32xf32, #tpu.memory_space<vmem>>, vector<8x32xf32>,
    } else {
    }
    %c0 = arith.constant 0 : index
    %c0_1 = arith.constant 0 : index
    %c0_2 = arith.constant 0 : index
    %3 = vector.load %arg1[%c0, %c0_1, %c0_2] : memref<4x8x32xf32, #tpu.memory_space<vmem>>, vector<4x8x32xf32>
    %4 = vector.shape_cast %3 : vector<4x8x32xf32> to vector<32x32xf32>
    %c0_3 = arith.constant 0 : index
    %c0_4 = arith.constant 0 : index
    %5 = vector.load %arg3[%c0_3, %c0_4] : memref<32x96xf32, #tpu.memory_space<vmem>>, vector<32x96xf32>
    %cst = arith.constant dense<0.000000e+00> : vector<32x96xf32>
    %6 = tpu.matmul %4, %5, %cst {dimension_numbers = #tpu.dot_dimension_numbers<[1], [0], [0], [1], [0, 0, 1, 1], [], []>} : vector<32x32xf32>, vector<32x96xf32>, vector<32x96xf32> -> vector<32x96xf32>
    %c0_5 = arith.constant 0 : index
    %c0_6 = arith.constant 0 : index
    %7 = vector.load %arg5[%c0_5, %c0_6] : memref<1x96xf32, #tpu.memory_space<vmem>>, vector<1x96xf32>
    %8 = vector.broadcast %7 : vector<1x96xf32> to vector<32x96xf32>
    %9 = arith.addf %6, %8 : vector<32x96xf32>
    %10 = vector.shape_cast %9 : vector<32x96xf32> to vector<4x8x96xf32>
    %c0_7 = arith.constant 0 : index
    %c0_8 = arith.constant 0 : index
    %c0_9 = arith.constant 0 : index
    %11 = vector.load %arg19[%c0_7, %c0_8, %c0_9] : memref<4x8x96xf32, #tpu.memory_space<vmem>>, vector<4x8x96xf32>
    tpu.vector_store %arg19[%c0_7, %c0_8, %c0_9], %10 {strides = array<i32>} : memref<4x8x96xf32, #tpu.memory_space<vmem>>, vector<4x8x96xf32>,
    %c0_10 = arith.constant 0 : index
    %c0_11 = arith.constant 0 : index
    %c0_12 = arith.constant 0 : index
    %12 = vector.load %arg2[%c0_10, %c0_11, %c0_12] : memref<4x8x32xf32, #tpu.memory_space<vmem>>, vector<4x8x32xf32>
    %13 = vector.shape_cast %12 : vector<4x8x32xf32> to vector<32x32xf32>
    %c0_13 = arith.constant 0 : index
    %c0_14 = arith.constant 0 : index
    %14 = vector.load %arg7[%c0_13, %c0_14] : memref<32x96xf32, #tpu.memory_space<vmem>>, vector<32x96xf32>
    %cst_15 = arith.constant dense<0.000000e+00> : vector<32x96xf32>
    %15 = tpu.matmul %13, %14, %cst_15 {dimension_numbers = #tpu.dot_dimension_numbers<[1], [0], [0], [1], [0, 0, 1, 1], [], []>} : vector<32x32xf32>, vector<32x96xf32>, vector<32x96xf32> -> vector<32x96xf32>
    %c0_16 = arith.constant 0 : index
    %c0_17 = arith.constant 0 : index
    %16 = vector.load %arg9[%c0_16, %c0_17] : memref<1x96xf32, #tpu.memory_space<vmem>>, vector<1x96xf32>
    %17 = vector.broadcast %16 : vector<1x96xf32> to vector<32x96xf32>
    %18 = arith.addf %15, %17 : vector<32x96xf32>
    %19 = vector.shape_cast %18 : vector<32x96xf32> to vector<4x8x96xf32>
    %c0_18 = arith.constant 0 : index
    %c0_19 = arith.constant 0 : index
    %c0_20 = arith.constant 0 : index
    %20 = vector.load %arg20[%c0_18, %c0_19, %c0_20] : memref<4x8x96xf32, #tpu.memory_space<vmem>>, vector<4x8x96xf32>
    tpu.vector_store %arg20[%c0_18, %c0_19, %c0_20], %19 {strides = array<i32>} : memref<4x8x96xf32, #tpu.memory_space<vmem>>, vector<4x8x96xf32>,
    %c0_21 = arith.constant 0 : index
    %c0_22 = arith.constant 0 : index
    %21 = vector.load %arg6[%c0_21, %c0_22] : memref<1x32xf32, #tpu.memory_space<vmem>>, vector<1x32xf32>
    %c0_23 = arith.constant 0 : index
    %c0_24 = arith.constant 0 : index
    %22 = vector.load %arg10[%c0_23, %c0_24] : memref<1x32xf32, #tpu.memory_space<vmem>>, vector<1x32xf32>
    %c0_25 = arith.constant 0 : index
    %c0_26 = arith.constant 0 : index
    %23 = vector.load %arg17[%c0_25, %c0_26] : memref<8x32xf32, #tpu.memory_space<vmem>>, vector<8x32xf32>
    %c0_27 = arith.constant 0 : index
    %c0_28 = arith.constant 0 : index
    %24 = vector.load %arg18[%c0_27, %c0_28] : memref<8x32xf32, #tpu.memory_space<vmem>>, vector<8x32xf32>
    %c0_i32_29 = arith.constant 0 : i32
    %c3_i32 = arith.constant 3 : i32
    %25 = arith.subi %c3_i32, %c0_i32_29 : i32
    %26 = arith.index_cast %c0_i32_29 : i32 to index
    %c0_30 = arith.constant 0 : index
    %c0_31 = arith.constant 0 : index
    %27 = vector.load %arg19[%26, %c0_30, %c0_31] : memref<4x8x96xf32, #tpu.memory_space<vmem>>, vector<1x8x96xf32>
    %28 = vector.shape_cast %27 : vector<1x8x96xf32> to vector<8x96xf32>
    %c0_32 = arith.constant 0 : index
    %c0_33 = arith.constant 0 : index
    %29 = vector.load %arg4[%c0_32, %c0_33] : memref<32x96xf32, #tpu.memory_space<vmem>>, vector<32x96xf32>
    %cst_34 = arith.constant dense<0.000000e+00> : vector<8x96xf32>
    %30 = tpu.matmul %23, %29, %cst_34 {dimension_numbers = #tpu.dot_dimension_numbers<[1], [0], [0], [1], [0, 0, 1, 1], [], []>} : vector<8x32xf32>, vector<32x96xf32>, vector<8x96xf32> -> vector<8x96xf32>
    %31 = vector.extract_strided_slice %28 {offsets = [0, 0], sizes = [8, 32], strides = [1, 1]} : vector<8x96xf32> to vector<8x32xf32>
    %32 = vector.extract_strided_slice %30 {offsets = [0, 0], sizes = [8, 32], strides = [1, 1]} : vector<8x96xf32> to vector<8x32xf32>
    %33 = arith.addf %31, %32 : vector<8x32xf32>
    %34 = arith.negf %33 : vector<8x32xf32>
    %35 = math.exp %34 : vector<8x32xf32>
    %cst_35 = arith.constant 1.000000e+00 : f32
    %36 = vector.broadcast %cst_35 : f32 to vector<8x32xf32>
    %37 = arith.addf %36, %35 : vector<8x32xf32>
    %38 = arith.divf %36, %37 : vector<8x32xf32>
    %39 = vector.extract_strided_slice %28 {offsets = [0, 32], sizes = [8, 32], strides = [1, 1]} : vector<8x96xf32> to vector<8x32xf32>
    %40 = vector.extract_strided_slice %30 {offsets = [0, 32], sizes = [8, 32], strides = [1, 1]} : vector<8x96xf32> to vector<8x32xf32>
    %41 = arith.addf %39, %40 : vector<8x32xf32>
    %42 = arith.negf %41 : vector<8x32xf32>
    %43 = math.exp %42 : vector<8x32xf32>
    %cst_36 = arith.constant 1.000000e+00 : f32
    %44 = vector.broadcast %cst_36 : f32 to vector<8x32xf32>
    %45 = arith.addf %44, %43 : vector<8x32xf32>
    %46 = arith.divf %44, %45 : vector<8x32xf32>
    %47 = vector.extract_strided_slice %28 {offsets = [0, 64], sizes = [8, 32], strides = [1, 1]} : vector<8x96xf32> to vector<8x32xf32>
    %48 = vector.extract_strided_slice %30 {offsets = [0, 64], sizes = [8, 32], strides = [1, 1]} : vector<8x96xf32> to vector<8x32xf32>
    %49 = vector.broadcast %21 : vector<1x32xf32> to vector<8x32xf32>
    %50 = arith.addf %48, %49 : vector<8x32xf32>
    %51 = arith.mulf %38, %50 : vector<8x32xf32>
    %52 = arith.addf %47, %51 : vector<8x32xf32>
    %53 = math.tanh %52 : vector<8x32xf32>
    %cst_37 = arith.constant 1.000000e+00 : f32
    %54 = vector.broadcast %cst_37 : f32 to vector<8x32xf32>
    %55 = arith.subf %54, %46 : vector<8x32xf32>
    %56 = arith.mulf %55, %53 : vector<8x32xf32>
    %57 = arith.mulf %46, %23 : vector<8x32xf32>
    %58 = arith.addf %56, %57 : vector<8x32xf32>
    %59 = arith.index_cast %25 : i32 to index
    %c0_38 = arith.constant 0 : index
    %c0_39 = arith.constant 0 : index
    %60 = vector.load %arg20[%59, %c0_38, %c0_39] : memref<4x8x96xf32, #tpu.memory_space<vmem>>, vector<1x8x96xf32>
    %61 = vector.shape_cast %60 : vector<1x8x96xf32> to vector<8x96xf32>
    %c0_40 = arith.constant 0 : index
    %c0_41 = arith.constant 0 : index
    %62 = vector.load %arg8[%c0_40, %c0_41] : memref<32x96xf32, #tpu.memory_space<vmem>>, vector<32x96xf32>
    %cst_42 = arith.constant dense<0.000000e+00> : vector<8x96xf32>
    %63 = tpu.matmul %24, %62, %cst_42 {dimension_numbers = #tpu.dot_dimension_numbers<[1], [0], [0], [1], [0, 0, 1, 1], [], []>} : vector<8x32xf32>, vector<32x96xf32>, vector<8x96xf32> -> vector<8x96xf32>
    %64 = vector.extract_strided_slice %61 {offsets = [0, 0], sizes = [8, 32], strides = [1, 1]} : vector<8x96xf32> to vector<8x32xf32>
    %65 = vector.extract_strided_slice %63 {offsets = [0, 0], sizes = [8, 32], strides = [1, 1]} : vector<8x96xf32> to vector<8x32xf32>
    %66 = arith.addf %64, %65 : vector<8x32xf32>
    %67 = arith.negf %66 : vector<8x32xf32>
    %68 = math.exp %67 : vector<8x32xf32>
    %cst_43 = arith.constant 1.000000e+00 : f32
    %69 = vector.broadcast %cst_43 : f32 to vector<8x32xf32>
    %70 = arith.addf %69, %68 : vector<8x32xf32>
    %71 = arith.divf %69, %70 : vector<8x32xf32>
    %72 = vector.extract_strided_slice %61 {offsets = [0, 32], sizes = [8, 32], strides = [1, 1]} : vector<8x96xf32> to vector<8x32xf32>
    %73 = vector.extract_strided_slice %63 {offsets = [0, 32], sizes = [8, 32], strides = [1, 1]} : vector<8x96xf32> to vector<8x32xf32>
    %74 = arith.addf %72, %73 : vector<8x32xf32>
    %75 = arith.negf %74 : vector<8x32xf32>
    %76 = math.exp %75 : vector<8x32xf32>
    %cst_44 = arith.constant 1.000000e+00 : f32
    %77 = vector.broadcast %cst_44 : f32 to vector<8x32xf32>
    %78 = arith.addf %77, %76 : vector<8x32xf32>
    %79 = arith.divf %77, %78 : vector<8x32xf32>
    %80 = vector.extract_strided_slice %61 {offsets = [0, 64], sizes = [8, 32], strides = [1, 1]} : vector<8x96xf32> to vector<8x32xf32>
    %81 = vector.extract_strided_slice %63 {offsets = [0, 64], sizes = [8, 32], strides = [1, 1]} : vector<8x96xf32> to vector<8x32xf32>
    %82 = vector.broadcast %22 : vector<1x32xf32> to vector<8x32xf32>
    %83 = arith.addf %81, %82 : vector<8x32xf32>
    %84 = arith.mulf %71, %83 : vector<8x32xf32>
    %85 = arith.addf %80, %84 : vector<8x32xf32>
    %86 = math.tanh %85 : vector<8x32xf32>
    %cst_45 = arith.constant 1.000000e+00 : f32
    %87 = vector.broadcast %cst_45 : f32 to vector<8x32xf32>
    %88 = arith.subf %87, %79 : vector<8x32xf32>
    %89 = arith.mulf %88, %86 : vector<8x32xf32>
    %90 = arith.mulf %79, %24 : vector<8x32xf32>
    %91 = arith.addf %89, %90 : vector<8x32xf32>
    %92 = arith.index_cast %c0_i32_29 : i32 to index
    %c0_46 = arith.constant 0 : index
    %c0_47 = arith.constant 0 : index
    %93 = vector.load %arg14[%92, %c0_46, %c0_47] : memref<4x8x32xf32, #tpu.memory_space<vmem>>, vector<1x8x32xf32>
    %94 = vector.shape_cast %93 : vector<1x8x32xf32> to vector<8x32xf32>
    %95 = vector.shape_cast %58 : vector<8x32xf32> to vector<1x8x32xf32>
    tpu.vector_store %arg14[%92, %c0_46, %c0_47], %95 {strides = array<i32>} : memref<4x8x32xf32, #tpu.memory_space<vmem>>, vector<1x8x32xf32>,
    %96 = arith.index_cast %25 : i32 to index
    %c0_48 = arith.constant 0 : index
    %c0_49 = arith.constant 0 : index
    %97 = vector.load %arg15[%96, %c0_48, %c0_49] : memref<4x8x32xf32, #tpu.memory_space<vmem>>, vector<1x8x32xf32>
    %98 = vector.shape_cast %97 : vector<1x8x32xf32> to vector<8x32xf32>
    %99 = vector.shape_cast %91 : vector<8x32xf32> to vector<1x8x32xf32>
    tpu.vector_store %arg15[%96, %c0_48, %c0_49], %99 {strides = array<i32>} : memref<4x8x32xf32, #tpu.memory_space<vmem>>, vector<1x8x32xf32>,
    %c1_i32 = arith.constant 1 : i32
    %c3_i32_50 = arith.constant 3 : i32
    %100 = arith.subi %c3_i32_50, %c1_i32 : i32
    %101 = arith.index_cast %c1_i32 : i32 to index
    %c0_51 = arith.constant 0 : index
    %c0_52 = arith.constant 0 : index
    %102 = vector.load %arg19[%101, %c0_51, %c0_52] : memref<4x8x96xf32, #tpu.memory_space<vmem>>, vector<1x8x96xf32>
    %103 = vector.shape_cast %102 : vector<1x8x96xf32> to vector<8x96xf32>
    %c0_53 = arith.constant 0 : index
    %c0_54 = arith.constant 0 : index
    %104 = vector.load %arg4[%c0_53, %c0_54] : memref<32x96xf32, #tpu.memory_space<vmem>>, vector<32x96xf32>
    %cst_55 = arith.constant dense<0.000000e+00> : vector<8x96xf32>
    %105 = tpu.matmul %58, %104, %cst_55 {dimension_numbers = #tpu.dot_dimension_numbers<[1], [0], [0], [1], [0, 0, 1, 1], [], []>} : vector<8x32xf32>, vector<32x96xf32>, vector<8x96xf32> -> vector<8x96xf32>
    %106 = vector.extract_strided_slice %103 {offsets = [0, 0], sizes = [8, 32], strides = [1, 1]} : vector<8x96xf32> to vector<8x32xf32>
    %107 = vector.extract_strided_slice %105 {offsets = [0, 0], sizes = [8, 32], strides = [1, 1]} : vector<8x96xf32> to vector<8x32xf32>
    %108 = arith.addf %106, %107 : vector<8x32xf32>
    %109 = arith.negf %108 : vector<8x32xf32>
    %110 = math.exp %109 : vector<8x32xf32>
    %cst_56 = arith.constant 1.000000e+00 : f32
    %111 = vector.broadcast %cst_56 : f32 to vector<8x32xf32>
    %112 = arith.addf %111, %110 : vector<8x32xf32>
    %113 = arith.divf %111, %112 : vector<8x32xf32>
    %114 = vector.extract_strided_slice %103 {offsets = [0, 32], sizes = [8, 32], strides = [1, 1]} : vector<8x96xf32> to vector<8x32xf32>
    %115 = vector.extract_strided_slice %105 {offsets = [0, 32], sizes = [8, 32], strides = [1, 1]} : vector<8x96xf32> to vector<8x32xf32>
    %116 = arith.addf %114, %115 : vector<8x32xf32>
    %117 = arith.negf %116 : vector<8x32xf32>
    %118 = math.exp %117 : vector<8x32xf32>
    %cst_57 = arith.constant 1.000000e+00 : f32
    %119 = vector.broadcast %cst_57 : f32 to vector<8x32xf32>
    %120 = arith.addf %119, %118 : vector<8x32xf32>
    %121 = arith.divf %119, %120 : vector<8x32xf32>
    %122 = vector.extract_strided_slice %103 {offsets = [0, 64], sizes = [8, 32], strides = [1, 1]} : vector<8x96xf32> to vector<8x32xf32>
    %123 = vector.extract_strided_slice %105 {offsets = [0, 64], sizes = [8, 32], strides = [1, 1]} : vector<8x96xf32> to vector<8x32xf32>
    %124 = vector.broadcast %21 : vector<1x32xf32> to vector<8x32xf32>
    %125 = arith.addf %123, %124 : vector<8x32xf32>
    %126 = arith.mulf %113, %125 : vector<8x32xf32>
    %127 = arith.addf %122, %126 : vector<8x32xf32>
    %128 = math.tanh %127 : vector<8x32xf32>
    %cst_58 = arith.constant 1.000000e+00 : f32
    %129 = vector.broadcast %cst_58 : f32 to vector<8x32xf32>
    %130 = arith.subf %129, %121 : vector<8x32xf32>
    %131 = arith.mulf %130, %128 : vector<8x32xf32>
    %132 = arith.mulf %121, %58 : vector<8x32xf32>
    %133 = arith.addf %131, %132 : vector<8x32xf32>
    %134 = arith.index_cast %100 : i32 to index
    %c0_59 = arith.constant 0 : index
    %c0_60 = arith.constant 0 : index
    %135 = vector.load %arg20[%134, %c0_59, %c0_60] : memref<4x8x96xf32, #tpu.memory_space<vmem>>, vector<1x8x96xf32>
    %136 = vector.shape_cast %135 : vector<1x8x96xf32> to vector<8x96xf32>
    %c0_61 = arith.constant 0 : index
    %c0_62 = arith.constant 0 : index
    %137 = vector.load %arg8[%c0_61, %c0_62] : memref<32x96xf32, #tpu.memory_space<vmem>>, vector<32x96xf32>
    %cst_63 = arith.constant dense<0.000000e+00> : vector<8x96xf32>
    %138 = tpu.matmul %91, %137, %cst_63 {dimension_numbers = #tpu.dot_dimension_numbers<[1], [0], [0], [1], [0, 0, 1, 1], [], []>} : vector<8x32xf32>, vector<32x96xf32>, vector<8x96xf32> -> vector<8x96xf32>
    %139 = vector.extract_strided_slice %136 {offsets = [0, 0], sizes = [8, 32], strides = [1, 1]} : vector<8x96xf32> to vector<8x32xf32>
    %140 = vector.extract_strided_slice %138 {offsets = [0, 0], sizes = [8, 32], strides = [1, 1]} : vector<8x96xf32> to vector<8x32xf32>
    %141 = arith.addf %139, %140 : vector<8x32xf32>
    %142 = arith.negf %141 : vector<8x32xf32>
    %143 = math.exp %142 : vector<8x32xf32>
    %cst_64 = arith.constant 1.000000e+00 : f32
    %144 = vector.broadcast %cst_64 : f32 to vector<8x32xf32>
    %145 = arith.addf %144, %143 : vector<8x32xf32>
    %146 = arith.divf %144, %145 : vector<8x32xf32>
    %147 = vector.extract_strided_slice %136 {offsets = [0, 32], sizes = [8, 32], strides = [1, 1]} : vector<8x96xf32> to vector<8x32xf32>
    %148 = vector.extract_strided_slice %138 {offsets = [0, 32], sizes = [8, 32], strides = [1, 1]} : vector<8x96xf32> to vector<8x32xf32>
    %149 = arith.addf %147, %148 : vector<8x32xf32>
    %150 = arith.negf %149 : vector<8x32xf32>
    %151 = math.exp %150 : vector<8x32xf32>
    %cst_65 = arith.constant 1.000000e+00 : f32
    %152 = vector.broadcast %cst_65 : f32 to vector<8x32xf32>
    %153 = arith.addf %152, %151 : vector<8x32xf32>
    %154 = arith.divf %152, %153 : vector<8x32xf32>
    %155 = vector.extract_strided_slice %136 {offsets = [0, 64], sizes = [8, 32], strides = [1, 1]} : vector<8x96xf32> to vector<8x32xf32>
    %156 = vector.extract_strided_slice %138 {offsets = [0, 64], sizes = [8, 32], strides = [1, 1]} : vector<8x96xf32> to vector<8x32xf32>
    %157 = vector.broadcast %22 : vector<1x32xf32> to vector<8x32xf32>
    %158 = arith.addf %156, %157 : vector<8x32xf32>
    %159 = arith.mulf %146, %158 : vector<8x32xf32>
    %160 = arith.addf %155, %159 : vector<8x32xf32>
    %161 = math.tanh %160 : vector<8x32xf32>
    %cst_66 = arith.constant 1.000000e+00 : f32
    %162 = vector.broadcast %cst_66 : f32 to vector<8x32xf32>
    %163 = arith.subf %162, %154 : vector<8x32xf32>
    %164 = arith.mulf %163, %161 : vector<8x32xf32>
    %165 = arith.mulf %154, %91 : vector<8x32xf32>
    %166 = arith.addf %164, %165 : vector<8x32xf32>
    %167 = arith.index_cast %c1_i32 : i32 to index
    %c0_67 = arith.constant 0 : index
    %c0_68 = arith.constant 0 : index
    %168 = vector.load %arg14[%167, %c0_67, %c0_68] : memref<4x8x32xf32, #tpu.memory_space<vmem>>, vector<1x8x32xf32>
    %169 = vector.shape_cast %168 : vector<1x8x32xf32> to vector<8x32xf32>
    %170 = vector.shape_cast %133 : vector<8x32xf32> to vector<1x8x32xf32>
    tpu.vector_store %arg14[%167, %c0_67, %c0_68], %170 {strides = array<i32>} : memref<4x8x32xf32, #tpu.memory_space<vmem>>, vector<1x8x32xf32>,
    %171 = arith.index_cast %100 : i32 to index
    %c0_69 = arith.constant 0 : index
    %c0_70 = arith.constant 0 : index
    %172 = vector.load %arg15[%171, %c0_69, %c0_70] : memref<4x8x32xf32, #tpu.memory_space<vmem>>, vector<1x8x32xf32>
    %173 = vector.shape_cast %172 : vector<1x8x32xf32> to vector<8x32xf32>
    %174 = vector.shape_cast %166 : vector<8x32xf32> to vector<1x8x32xf32>
    tpu.vector_store %arg15[%171, %c0_69, %c0_70], %174 {strides = array<i32>} : memref<4x8x32xf32, #tpu.memory_space<vmem>>, vector<1x8x32xf32>,
    %c2_i32 = arith.constant 2 : i32
    %c3_i32_71 = arith.constant 3 : i32
    %175 = arith.subi %c3_i32_71, %c2_i32 : i32
    %176 = arith.index_cast %c2_i32 : i32 to index
    %c0_72 = arith.constant 0 : index
    %c0_73 = arith.constant 0 : index
    %177 = vector.load %arg19[%176, %c0_72, %c0_73] : memref<4x8x96xf32, #tpu.memory_space<vmem>>, vector<1x8x96xf32>
    %178 = vector.shape_cast %177 : vector<1x8x96xf32> to vector<8x96xf32>
    %c0_74 = arith.constant 0 : index
    %c0_75 = arith.constant 0 : index
    %179 = vector.load %arg4[%c0_74, %c0_75] : memref<32x96xf32, #tpu.memory_space<vmem>>, vector<32x96xf32>
    %cst_76 = arith.constant dense<0.000000e+00> : vector<8x96xf32>
    %180 = tpu.matmul %133, %179, %cst_76 {dimension_numbers = #tpu.dot_dimension_numbers<[1], [0], [0], [1], [0, 0, 1, 1], [], []>} : vector<8x32xf32>, vector<32x96xf32>, vector<8x96xf32> -> vector<8x96xf32>
    %181 = vector.extract_strided_slice %178 {offsets = [0, 0], sizes = [8, 32], strides = [1, 1]} : vector<8x96xf32> to vector<8x32xf32>
    %182 = vector.extract_strided_slice %180 {offsets = [0, 0], sizes = [8, 32], strides = [1, 1]} : vector<8x96xf32> to vector<8x32xf32>
    %183 = arith.addf %181, %182 : vector<8x32xf32>
    %184 = arith.negf %183 : vector<8x32xf32>
    %185 = math.exp %184 : vector<8x32xf32>
    %cst_77 = arith.constant 1.000000e+00 : f32
    %186 = vector.broadcast %cst_77 : f32 to vector<8x32xf32>
    %187 = arith.addf %186, %185 : vector<8x32xf32>
    %188 = arith.divf %186, %187 : vector<8x32xf32>
    %189 = vector.extract_strided_slice %178 {offsets = [0, 32], sizes = [8, 32], strides = [1, 1]} : vector<8x96xf32> to vector<8x32xf32>
    %190 = vector.extract_strided_slice %180 {offsets = [0, 32], sizes = [8, 32], strides = [1, 1]} : vector<8x96xf32> to vector<8x32xf32>
    %191 = arith.addf %189, %190 : vector<8x32xf32>
    %192 = arith.negf %191 : vector<8x32xf32>
    %193 = math.exp %192 : vector<8x32xf32>
    %cst_78 = arith.constant 1.000000e+00 : f32
    %194 = vector.broadcast %cst_78 : f32 to vector<8x32xf32>
    %195 = arith.addf %194, %193 : vector<8x32xf32>
    %196 = arith.divf %194, %195 : vector<8x32xf32>
    %197 = vector.extract_strided_slice %178 {offsets = [0, 64], sizes = [8, 32], strides = [1, 1]} : vector<8x96xf32> to vector<8x32xf32>
    %198 = vector.extract_strided_slice %180 {offsets = [0, 64], sizes = [8, 32], strides = [1, 1]} : vector<8x96xf32> to vector<8x32xf32>
    %199 = vector.broadcast %21 : vector<1x32xf32> to vector<8x32xf32>
    %200 = arith.addf %198, %199 : vector<8x32xf32>
    %201 = arith.mulf %188, %200 : vector<8x32xf32>
    %202 = arith.addf %197, %201 : vector<8x32xf32>
    %203 = math.tanh %202 : vector<8x32xf32>
    %cst_79 = arith.constant 1.000000e+00 : f32
    %204 = vector.broadcast %cst_79 : f32 to vector<8x32xf32>
    %205 = arith.subf %204, %196 : vector<8x32xf32>
    %206 = arith.mulf %205, %203 : vector<8x32xf32>
    %207 = arith.mulf %196, %133 : vector<8x32xf32>
    %208 = arith.addf %206, %207 : vector<8x32xf32>
    %209 = arith.index_cast %175 : i32 to index
    %c0_80 = arith.constant 0 : index
    %c0_81 = arith.constant 0 : index
    %210 = vector.load %arg20[%209, %c0_80, %c0_81] : memref<4x8x96xf32, #tpu.memory_space<vmem>>, vector<1x8x96xf32>
    %211 = vector.shape_cast %210 : vector<1x8x96xf32> to vector<8x96xf32>
    %c0_82 = arith.constant 0 : index
    %c0_83 = arith.constant 0 : index
    %212 = vector.load %arg8[%c0_82, %c0_83] : memref<32x96xf32, #tpu.memory_space<vmem>>, vector<32x96xf32>
    %cst_84 = arith.constant dense<0.000000e+00> : vector<8x96xf32>
    %213 = tpu.matmul %166, %212, %cst_84 {dimension_numbers = #tpu.dot_dimension_numbers<[1], [0], [0], [1], [0, 0, 1, 1], [], []>} : vector<8x32xf32>, vector<32x96xf32>, vector<8x96xf32> -> vector<8x96xf32>
    %214 = vector.extract_strided_slice %211 {offsets = [0, 0], sizes = [8, 32], strides = [1, 1]} : vector<8x96xf32> to vector<8x32xf32>
    %215 = vector.extract_strided_slice %213 {offsets = [0, 0], sizes = [8, 32], strides = [1, 1]} : vector<8x96xf32> to vector<8x32xf32>
    %216 = arith.addf %214, %215 : vector<8x32xf32>
    %217 = arith.negf %216 : vector<8x32xf32>
    %218 = math.exp %217 : vector<8x32xf32>
    %cst_85 = arith.constant 1.000000e+00 : f32
    %219 = vector.broadcast %cst_85 : f32 to vector<8x32xf32>
    %220 = arith.addf %219, %218 : vector<8x32xf32>
    %221 = arith.divf %219, %220 : vector<8x32xf32>
    %222 = vector.extract_strided_slice %211 {offsets = [0, 32], sizes = [8, 32], strides = [1, 1]} : vector<8x96xf32> to vector<8x32xf32>
    %223 = vector.extract_strided_slice %213 {offsets = [0, 32], sizes = [8, 32], strides = [1, 1]} : vector<8x96xf32> to vector<8x32xf32>
    %224 = arith.addf %222, %223 : vector<8x32xf32>
    %225 = arith.negf %224 : vector<8x32xf32>
    %226 = math.exp %225 : vector<8x32xf32>
    %cst_86 = arith.constant 1.000000e+00 : f32
    %227 = vector.broadcast %cst_86 : f32 to vector<8x32xf32>
    %228 = arith.addf %227, %226 : vector<8x32xf32>
    %229 = arith.divf %227, %228 : vector<8x32xf32>
    %230 = vector.extract_strided_slice %211 {offsets = [0, 64], sizes = [8, 32], strides = [1, 1]} : vector<8x96xf32> to vector<8x32xf32>
    %231 = vector.extract_strided_slice %213 {offsets = [0, 64], sizes = [8, 32], strides = [1, 1]} : vector<8x96xf32> to vector<8x32xf32>
    %232 = vector.broadcast %22 : vector<1x32xf32> to vector<8x32xf32>
    %233 = arith.addf %231, %232 : vector<8x32xf32>
    %234 = arith.mulf %221, %233 : vector<8x32xf32>
    %235 = arith.addf %230, %234 : vector<8x32xf32>
    %236 = math.tanh %235 : vector<8x32xf32>
    %cst_87 = arith.constant 1.000000e+00 : f32
    %237 = vector.broadcast %cst_87 : f32 to vector<8x32xf32>
    %238 = arith.subf %237, %229 : vector<8x32xf32>
    %239 = arith.mulf %238, %236 : vector<8x32xf32>
    %240 = arith.mulf %229, %166 : vector<8x32xf32>
    %241 = arith.addf %239, %240 : vector<8x32xf32>
    %242 = arith.index_cast %c2_i32 : i32 to index
    %c0_88 = arith.constant 0 : index
    %c0_89 = arith.constant 0 : index
    %243 = vector.load %arg14[%242, %c0_88, %c0_89] : memref<4x8x32xf32, #tpu.memory_space<vmem>>, vector<1x8x32xf32>
    %244 = vector.shape_cast %243 : vector<1x8x32xf32> to vector<8x32xf32>
    %245 = vector.shape_cast %208 : vector<8x32xf32> to vector<1x8x32xf32>
    tpu.vector_store %arg14[%242, %c0_88, %c0_89], %245 {strides = array<i32>} : memref<4x8x32xf32, #tpu.memory_space<vmem>>, vector<1x8x32xf32>,
    %246 = arith.index_cast %175 : i32 to index
    %c0_90 = arith.constant 0 : index
    %c0_91 = arith.constant 0 : index
    %247 = vector.load %arg15[%246, %c0_90, %c0_91] : memref<4x8x32xf32, #tpu.memory_space<vmem>>, vector<1x8x32xf32>
    %248 = vector.shape_cast %247 : vector<1x8x32xf32> to vector<8x32xf32>
    %249 = vector.shape_cast %241 : vector<8x32xf32> to vector<1x8x32xf32>
    tpu.vector_store %arg15[%246, %c0_90, %c0_91], %249 {strides = array<i32>} : memref<4x8x32xf32, #tpu.memory_space<vmem>>, vector<1x8x32xf32>,
    %c3_i32_92 = arith.constant 3 : i32
    %c3_i32_93 = arith.constant 3 : i32
    %250 = arith.subi %c3_i32_93, %c3_i32_92 : i32
    %251 = arith.index_cast %c3_i32_92 : i32 to index
    %c0_94 = arith.constant 0 : index
    %c0_95 = arith.constant 0 : index
    %252 = vector.load %arg19[%251, %c0_94, %c0_95] : memref<4x8x96xf32, #tpu.memory_space<vmem>>, vector<1x8x96xf32>
    %253 = vector.shape_cast %252 : vector<1x8x96xf32> to vector<8x96xf32>
    %c0_96 = arith.constant 0 : index
    %c0_97 = arith.constant 0 : index
    %254 = vector.load %arg4[%c0_96, %c0_97] : memref<32x96xf32, #tpu.memory_space<vmem>>, vector<32x96xf32>
    %cst_98 = arith.constant dense<0.000000e+00> : vector<8x96xf32>
    %255 = tpu.matmul %208, %254, %cst_98 {dimension_numbers = #tpu.dot_dimension_numbers<[1], [0], [0], [1], [0, 0, 1, 1], [], []>} : vector<8x32xf32>, vector<32x96xf32>, vector<8x96xf32> -> vector<8x96xf32>
    %256 = vector.extract_strided_slice %253 {offsets = [0, 0], sizes = [8, 32], strides = [1, 1]} : vector<8x96xf32> to vector<8x32xf32>
    %257 = vector.extract_strided_slice %255 {offsets = [0, 0], sizes = [8, 32], strides = [1, 1]} : vector<8x96xf32> to vector<8x32xf32>
    %258 = arith.addf %256, %257 : vector<8x32xf32>
    %259 = arith.negf %258 : vector<8x32xf32>
    %260 = math.exp %259 : vector<8x32xf32>
    %cst_99 = arith.constant 1.000000e+00 : f32
    %261 = vector.broadcast %cst_99 : f32 to vector<8x32xf32>
    %262 = arith.addf %261, %260 : vector<8x32xf32>
    %263 = arith.divf %261, %262 : vector<8x32xf32>
    %264 = vector.extract_strided_slice %253 {offsets = [0, 32], sizes = [8, 32], strides = [1, 1]} : vector<8x96xf32> to vector<8x32xf32>
    %265 = vector.extract_strided_slice %255 {offsets = [0, 32], sizes = [8, 32], strides = [1, 1]} : vector<8x96xf32> to vector<8x32xf32>
    %266 = arith.addf %264, %265 : vector<8x32xf32>
    %267 = arith.negf %266 : vector<8x32xf32>
    %268 = math.exp %267 : vector<8x32xf32>
    %cst_100 = arith.constant 1.000000e+00 : f32
    %269 = vector.broadcast %cst_100 : f32 to vector<8x32xf32>
    %270 = arith.addf %269, %268 : vector<8x32xf32>
    %271 = arith.divf %269, %270 : vector<8x32xf32>
    %272 = vector.extract_strided_slice %253 {offsets = [0, 64], sizes = [8, 32], strides = [1, 1]} : vector<8x96xf32> to vector<8x32xf32>
    %273 = vector.extract_strided_slice %255 {offsets = [0, 64], sizes = [8, 32], strides = [1, 1]} : vector<8x96xf32> to vector<8x32xf32>
    %274 = vector.broadcast %21 : vector<1x32xf32> to vector<8x32xf32>
    %275 = arith.addf %273, %274 : vector<8x32xf32>
    %276 = arith.mulf %263, %275 : vector<8x32xf32>
    %277 = arith.addf %272, %276 : vector<8x32xf32>
    %278 = math.tanh %277 : vector<8x32xf32>
    %cst_101 = arith.constant 1.000000e+00 : f32
    %279 = vector.broadcast %cst_101 : f32 to vector<8x32xf32>
    %280 = arith.subf %279, %271 : vector<8x32xf32>
    %281 = arith.mulf %280, %278 : vector<8x32xf32>
    %282 = arith.mulf %271, %208 : vector<8x32xf32>
    %283 = arith.addf %281, %282 : vector<8x32xf32>
    %284 = arith.index_cast %250 : i32 to index
    %c0_102 = arith.constant 0 : index
    %c0_103 = arith.constant 0 : index
    %285 = vector.load %arg20[%284, %c0_102, %c0_103] : memref<4x8x96xf32, #tpu.memory_space<vmem>>, vector<1x8x96xf32>
    %286 = vector.shape_cast %285 : vector<1x8x96xf32> to vector<8x96xf32>
    %c0_104 = arith.constant 0 : index
    %c0_105 = arith.constant 0 : index
    %287 = vector.load %arg8[%c0_104, %c0_105] : memref<32x96xf32, #tpu.memory_space<vmem>>, vector<32x96xf32>
    %cst_106 = arith.constant dense<0.000000e+00> : vector<8x96xf32>
    %288 = tpu.matmul %241, %287, %cst_106 {dimension_numbers = #tpu.dot_dimension_numbers<[1], [0], [0], [1], [0, 0, 1, 1], [], []>} : vector<8x32xf32>, vector<32x96xf32>, vector<8x96xf32> -> vector<8x96xf32>
    %289 = vector.extract_strided_slice %286 {offsets = [0, 0], sizes = [8, 32], strides = [1, 1]} : vector<8x96xf32> to vector<8x32xf32>
    %290 = vector.extract_strided_slice %288 {offsets = [0, 0], sizes = [8, 32], strides = [1, 1]} : vector<8x96xf32> to vector<8x32xf32>
    %291 = arith.addf %289, %290 : vector<8x32xf32>
    %292 = arith.negf %291 : vector<8x32xf32>
    %293 = math.exp %292 : vector<8x32xf32>
    %cst_107 = arith.constant 1.000000e+00 : f32
    %294 = vector.broadcast %cst_107 : f32 to vector<8x32xf32>
    %295 = arith.addf %294, %293 : vector<8x32xf32>
    %296 = arith.divf %294, %295 : vector<8x32xf32>
    %297 = vector.extract_strided_slice %286 {offsets = [0, 32], sizes = [8, 32], strides = [1, 1]} : vector<8x96xf32> to vector<8x32xf32>
    %298 = vector.extract_strided_slice %288 {offsets = [0, 32], sizes = [8, 32], strides = [1, 1]} : vector<8x96xf32> to vector<8x32xf32>
    %299 = arith.addf %297, %298 : vector<8x32xf32>
    %300 = arith.negf %299 : vector<8x32xf32>
    %301 = math.exp %300 : vector<8x32xf32>
    %cst_108 = arith.constant 1.000000e+00 : f32
    %302 = vector.broadcast %cst_108 : f32 to vector<8x32xf32>
    %303 = arith.addf %302, %301 : vector<8x32xf32>
    %304 = arith.divf %302, %303 : vector<8x32xf32>
    %305 = vector.extract_strided_slice %286 {offsets = [0, 64], sizes = [8, 32], strides = [1, 1]} : vector<8x96xf32> to vector<8x32xf32>
    %306 = vector.extract_strided_slice %288 {offsets = [0, 64], sizes = [8, 32], strides = [1, 1]} : vector<8x96xf32> to vector<8x32xf32>
    %307 = vector.broadcast %22 : vector<1x32xf32> to vector<8x32xf32>
    %308 = arith.addf %306, %307 : vector<8x32xf32>
    %309 = arith.mulf %296, %308 : vector<8x32xf32>
    %310 = arith.addf %305, %309 : vector<8x32xf32>
    %311 = math.tanh %310 : vector<8x32xf32>
    %cst_109 = arith.constant 1.000000e+00 : f32
    %312 = vector.broadcast %cst_109 : f32 to vector<8x32xf32>
    %313 = arith.subf %312, %304 : vector<8x32xf32>
    %314 = arith.mulf %313, %311 : vector<8x32xf32>
    %315 = arith.mulf %304, %241 : vector<8x32xf32>
    %316 = arith.addf %314, %315 : vector<8x32xf32>
    %317 = arith.index_cast %c3_i32_92 : i32 to index
    %c0_110 = arith.constant 0 : index
    %c0_111 = arith.constant 0 : index
    %318 = vector.load %arg14[%317, %c0_110, %c0_111] : memref<4x8x32xf32, #tpu.memory_space<vmem>>, vector<1x8x32xf32>
    %319 = vector.shape_cast %318 : vector<1x8x32xf32> to vector<8x32xf32>
    %320 = vector.shape_cast %283 : vector<8x32xf32> to vector<1x8x32xf32>
    tpu.vector_store %arg14[%317, %c0_110, %c0_111], %320 {strides = array<i32>} : memref<4x8x32xf32, #tpu.memory_space<vmem>>, vector<1x8x32xf32>,
    %321 = arith.index_cast %250 : i32 to index
    %c0_112 = arith.constant 0 : index
    %c0_113 = arith.constant 0 : index
    %322 = vector.load %arg15[%321, %c0_112, %c0_113] : memref<4x8x32xf32, #tpu.memory_space<vmem>>, vector<1x8x32xf32>
    %323 = vector.shape_cast %322 : vector<1x8x32xf32> to vector<8x32xf32>
    %324 = vector.shape_cast %316 : vector<8x32xf32> to vector<1x8x32xf32>
    tpu.vector_store %arg15[%321, %c0_112, %c0_113], %324 {strides = array<i32>} : memref<4x8x32xf32, #tpu.memory_space<vmem>>, vector<1x8x32xf32>,
    %c4_i32 = arith.constant 4 : i32
    %c0_114 = arith.constant 0 : index
    %c0_115 = arith.constant 0 : index
    %325 = vector.load %arg17[%c0_114, %c0_115] : memref<8x32xf32, #tpu.memory_space<vmem>>, vector<8x32xf32>
    tpu.vector_store %arg17[%c0_114, %c0_115], %283 {strides = array<i32>} : memref<8x32xf32, #tpu.memory_space<vmem>>, vector<8x32xf32>,
    %c0_116 = arith.constant 0 : index
    %c0_117 = arith.constant 0 : index
    %326 = vector.load %arg18[%c0_116, %c0_117] : memref<8x32xf32, #tpu.memory_space<vmem>>, vector<8x32xf32>
    tpu.vector_store %arg18[%c0_116, %c0_117], %316 {strides = array<i32>} : memref<8x32xf32, #tpu.memory_space<vmem>>, vector<8x32xf32>,
    %c1_i32_118 = arith.constant 1 : i32
    %327 = arith.cmpi eq, %arg0, %c1_i32_118 : i32
    %328 = arith.extui %327 : i1 to i32
    %c0_i32_119 = arith.constant 0 : i32
    %329 = arith.cmpi ne, %328, %c0_i32_119 : i32
    scf.if %329 {
      %c0_120 = arith.constant 0 : index
      %c0_121 = arith.constant 0 : index
      %330 = vector.load %arg11[%c0_120, %c0_121] : memref<32x32xf32, #tpu.memory_space<vmem>>, vector<32x32xf32>
      %cst_122 = arith.constant dense<0.000000e+00> : vector<8x32xf32>
      %331 = tpu.matmul %283, %330, %cst_122 {dimension_numbers = #tpu.dot_dimension_numbers<[1], [0], [0], [1], [0, 0, 1, 1], [], []>} : vector<8x32xf32>, vector<32x32xf32>, vector<8x32xf32> -> vector<8x32xf32>
      %c0_123 = arith.constant 0 : index
      %c0_124 = arith.constant 0 : index
      %332 = vector.load %arg12[%c0_123, %c0_124] : memref<32x32xf32, #tpu.memory_space<vmem>>, vector<32x32xf32>
      %cst_125 = arith.constant dense<0.000000e+00> : vector<8x32xf32>
      %333 = tpu.matmul %316, %332, %cst_125 {dimension_numbers = #tpu.dot_dimension_numbers<[1], [0], [0], [1], [0, 0, 1, 1], [], []>} : vector<8x32xf32>, vector<32x32xf32>, vector<8x32xf32> -> vector<8x32xf32>
      %334 = arith.addf %331, %333 : vector<8x32xf32>
      %c0_126 = arith.constant 0 : index
      %c0_127 = arith.constant 0 : index
      %335 = vector.load %arg13[%c0_126, %c0_127] : memref<1x32xf32, #tpu.memory_space<vmem>>, vector<1x32xf32>
      %336 = vector.broadcast %335 : vector<1x32xf32> to vector<8x32xf32>
      %337 = arith.addf %334, %336 : vector<8x32xf32>
      %338 = math.tanh %337 : vector<8x32xf32>
      %c0_128 = arith.constant 0 : index
      %c0_129 = arith.constant 0 : index
      %339 = vector.load %arg16[%c0_128, %c0_129] : memref<8x32xf32, #tpu.memory_space<vmem>>, vector<8x32xf32>
      tpu.vector_store %arg16[%c0_128, %c0_129], %338 {strides = array<i32>} : memref<8x32xf32, #tpu.memory_space<vmem>>, vector<8x32xf32>,
    } else {
    }
    return
  }
  func.func @transform_0(%arg0: i32) -> (i32, i32, i32) {
    %c0_i32 = arith.constant 0 : i32
    %c0_i32_0 = arith.constant 0 : i32
    %c0_i32_1 = arith.constant 0 : i32
    return %arg0, %c0_i32, %c0_i32_0 : i32, i32, i32
  }
  func.func @transform_1(%arg0: i32) -> (i32, i32, i32) {
    %c1_i32 = arith.constant 1 : i32
    %0 = arith.subi %c1_i32, %arg0 : i32
    %c0_i32 = arith.constant 0 : i32
    %c0_i32_0 = arith.constant 0 : i32
    %c0_i32_1 = arith.constant 0 : i32
    return %0, %c0_i32, %c0_i32_0 : i32, i32, i32
  }
  func.func @transform_2(%arg0: i32) -> (i32, i32) {
    %c0_i32 = arith.constant 0 : i32
    %c0_i32_0 = arith.constant 0 : i32
    %c0_i32_1 = arith.constant 0 : i32
    return %c0_i32, %c0_i32_0 : i32, i32
  }
  func.func @transform_3(%arg0: i32) -> (i32, i32) {
    %c0_i32 = arith.constant 0 : i32
    %c0_i32_0 = arith.constant 0 : i32
    %c0_i32_1 = arith.constant 0 : i32
    return %c0_i32, %c0_i32_0 : i32, i32
  }
  func.func @transform_4(%arg0: i32) -> (i32, i32) {
    %c0_i32 = arith.constant 0 : i32
    %c0_i32_0 = arith.constant 0 : i32
    %c0_i32_1 = arith.constant 0 : i32
    return %c0_i32, %c0_i32_0 : i32, i32
  }
  func.func @transform_5(%arg0: i32) -> (i32, i32) {
    %c0_i32 = arith.constant 0 : i32
    %c0_i32_0 = arith.constant 0 : i32
    %c0_i32_1 = arith.constant 0 : i32
    return %c0_i32, %c0_i32_0 : i32, i32
  }
  func.func @transform_6(%arg0: i32) -> (i32, i32) {
    %c0_i32 = arith.constant 0 : i32
    %c0_i32_0 = arith.constant 0 : i32
    %c0_i32_1 = arith.constant 0 : i32
    return %c0_i32, %c0_i32_0 : i32, i32
  }
  func.func @transform_7(%arg0: i32) -> (i32, i32) {
    %c0_i32 = arith.constant 0 : i32
    %c0_i32_0 = arith.constant 0 : i32
    %c0_i32_1 = arith.constant 0 : i32
    return %c0_i32, %c0_i32_0 : i32, i32
  }
  func.func @transform_8(%arg0: i32) -> (i32, i32) {
    %c0_i32 = arith.constant 0 : i32
    %c0_i32_0 = arith.constant 0 : i32
    %c0_i32_1 = arith.constant 0 : i32
    return %c0_i32, %c0_i32_0 : i32, i32
  }
  func.func @transform_9(%arg0: i32) -> (i32, i32) {
    %c0_i32 = arith.constant 0 : i32
    %c0_i32_0 = arith.constant 0 : i32
    %c0_i32_1 = arith.constant 0 : i32
    return %c0_i32, %c0_i32_0 : i32, i32
  }
  func.func @transform_10(%arg0: i32) -> (i32, i32) {
    %c0_i32 = arith.constant 0 : i32
    %c0_i32_0 = arith.constant 0 : i32
    %c0_i32_1 = arith.constant 0 : i32
    return %c0_i32, %c0_i32_0 : i32, i32
  }
  func.func @transform_11(%arg0: i32) -> (i32, i32) {
    %c0_i32 = arith.constant 0 : i32
    %c0_i32_0 = arith.constant 0 : i32
    %c0_i32_1 = arith.constant 0 : i32
    return %c0_i32, %c0_i32_0 : i32, i32
  }
  func.func @transform_12(%arg0: i32) -> (i32, i32) {
    %c0_i32 = arith.constant 0 : i32
    %c0_i32_0 = arith.constant 0 : i32
    %c0_i32_1 = arith.constant 0 : i32
    return %c0_i32, %c0_i32_0 : i32, i32
  }
  func.func @transform_13(%arg0: i32) -> (i32, i32, i32) {
    %c0_i32 = arith.constant 0 : i32
    %c0_i32_0 = arith.constant 0 : i32
    %c0_i32_1 = arith.constant 0 : i32
    return %arg0, %c0_i32, %c0_i32_0 : i32, i32, i32
  }
  func.func @transform_14(%arg0: i32) -> (i32, i32, i32) {
    %c1_i32 = arith.constant 1 : i32
    %0 = arith.subi %c1_i32, %arg0 : i32
    %c0_i32 = arith.constant 0 : i32
    %c0_i32_0 = arith.constant 0 : i32
    %c0_i32_1 = arith.constant 0 : i32
    return %0, %c0_i32, %c0_i32_0 : i32, i32, i32
  }
  func.func @transform_15(%arg0: i32) -> (i32, i32) {
    %c0_i32 = arith.constant 0 : i32
    %c0_i32_0 = arith.constant 0 : i32
    %c0_i32_1 = arith.constant 0 : i32
    return %c0_i32, %c0_i32_0 : i32, i32
  }
}

</mosaic_0001>

<bundles_post_ra>
// kernel: encoder_forward.1
= control target key start
LH: loop header
LB: loop body
LE: loop exit
PB: predicated region body
PF: predicated region fallthrough
CT: control target
= control target key end

     0   :  { %s2395_s18 = smov 0   ;;  %s2741_s0 = inlined_call_operand.vmem [shape: f32[8,8,32], index: 0, kind: input, shape index: {}, may-alias: {0,1}]   ;;  %s2742_s1 = inlined_call_operand.vmem [shape: f32[8,8,32], index: 1, kind: input, shape index: {}, may-alias: {0,1}]   ;;  %s2743_s2 = inlined_call_operand.vmem [shape: f32[32,96], index: 2, kind: input, shape index: {}]   ;;  %s2744_s3 = inlined_call_operand.vmem [shape: f32[32,96], index: 3, kind: input, shape index: {}]   ;;  %s2745_s4 = inlined_call_operand.vmem [shape: f32[1,96], index: 4, kind: input, shape index: {}]   ;;  %s2746_s5 = inlined_call_operand.vmem [shape: f32[1,32], index: 5, kind: input, shape index: {}]   ;;  %s2747_s6 = inlined_call_operand.vmem [shape: f32[32,96], index: 6, kind: input, shape index: {}]   ;;  %s2748_s7 = inlined_call_operand.vmem [shape: f32[32,96], index: 7, kind: input, shape index: {}]   ;;  %s2749_s8 = inlined_call_operand.vmem [shape: f32[1,96], index: 8, kind: input, shape index: {}]   ;;  %s2750_s9 = inlined_call_operand.vmem [shape: f32[1,32], index: 9, kind: input, shape index: {}]   ;;  %s2751_s10 = inlined_call_operand.vmem [shape: f32[32,32], index: 10, kind: input, shape index: {}]   ;;  %s2752_s11 = inlined_call_operand.vmem [shape: f32[32,32], index: 11, kind: input, shape index: {}]   ;;  %s2753_s12 = inlined_call_operand.vmem [shape: f32[1,32], index: 12, kind: input, shape index: {}]   ;;  %s2754_s13 = inlined_call_operand.vmem [shape: f32[8,8,32], index: 13, kind: output, shape index: {0}]   ;;  %s2755_s14 = inlined_call_operand.vmem [shape: f32[8,8,32], index: 14, kind: output, shape index: {1}]   ;;  %s2756_s15 = inlined_call_operand.vmem [shape: f32[8,32], index: 15, kind: output, shape index: {2}]  }
   0x1   :  { %2758 = sst [smem:[#allocation7_spill]] %s2756_s15 }
   0x2 LB: > { %2759 = sst [smem:[#allocation6_spill]] %s2305_s18  ;;  %s2401_s19 = sadd.s32 4294967295, %s2305_s18   ;;  %s2305_s18 = sphi %s2395_s18, %s26_s18  }
   0x3   : > { %p1979_p0 = scmp.ge.s32.totalorder %s2305_s18, 1  ;;  %p455_p1 = scmp.lt.s32.totalorder %s2305_s18, 3 }
   0x5   : > { %p456_p2 = pnand %p1979_p0, %p455_p1 }
   0x6   : > { %s1980_s20 = sshll.u32 (!%p456_p2), %s2401_s19, 2  ;;  %s521_s21 = ssub.s32 (!%p456_p2), 1, %s2401_s19 }
   0x7   : > { %459 = sbr.rel (%p456_p2) target bundleno = 2978 (0xba2), region = 72  ;;  %p516_p3 = scmp.lt.s32.totalorder (!%p456_p2), %s1980_s20, 7 }
   0x8   : > { %s1982_s22 = sshll.u32 (!%p456_p2), %s521_s21, 2  ;;  %p1988_p5 = scmp.ne.s32.totalorder (!%p456_p2), %s2401_s19, 0 }
   0x9   : > { %p523_p4 = scmp.lt.s32.totalorder (!%p456_p2), %s1982_s22, 7 }
   0xc   : > { %s2763_s20 = smov (!%p516_p3, %s1980_s20), 7  ;;  %s2765_s22 = smov (!%p523_p4, %s1982_s22), 7 }
   0xd   : > { %s1981_s23 = sshll.u32 %s2763_s20, 3  ;;  %s1983_s27 = sshll.u32 %s2765_s22, 3 }
   0xe   : > { %s2410_s26 = scalar_lea.vmem %s2741_s0, %s1981_s23  ;;  %s2415_s30 = scalar_lea.vmem %s2742_s1, %s1983_s27 }
   0xf   : > { %s2420_s18 = scalar_lea.vmem %s2754_s13, %s1981_s23  ;;  %s2425_s20 = scalar_lea.vmem %s2755_s14, %s1983_s27 }
  0x10   : > { %546 = sbr.rel (%p1988_p5) target bundleno = 23 (0x17), region = 76 }
  0x15   : > { %vm547_vm0 = vcmask 261120   ;;  %v2307_v0 = vmov 0.0  }
  0x16   : > { %548 = vst.msk [vmem:[#allocation2] sm:$0xff] %vm547_vm0, %v2307_v0  ;;  %549 = vst.msk [vmem:[#allocation3] sm:$0xff] %vm547_vm0, %v2307_v0 }
  0x17 PF: > { %v557_v1 = vld [vmem:[%s2743_s2 + $0x18] sm:$0xff]  ;;  %v556_v3 = vld [vmem:[%s2743_s2 + $0x10] sm:$0xff]  ;;  %v555_v5 = vld [vmem:[%s2743_s2 + $0x8] sm:$0xff]  ;;  %vm565_vm1 = vcmask 261120   ;;  %v2308_v16 = vmov 0.0   ;;  %vm2309_vm2 = vmmov 0  }
  0x18   : > { %v675_v2 = vld [vmem:[%s2747_s6 + $0x18] sm:$0xff]  ;;  %2095 = vmatprep.subr.mxu0 %v557_v1  ;;  %v674_v4 = vld [vmem:[%s2747_s6 + $0x10] sm:$0xff]  ;;  %v673_v6 = vld [vmem:[%s2747_s6 + $0x8] sm:$0xff]  ;;  %s2310_s21 = smov 64   ;;  %vm663_vm3 = vcmask 785408   ;;  %s2311_s28 = smov 32  }
  0x19   : > { %2109 = vmatprep.subr.mxu1 %v675_v2  ;;  %2096 = vmatpush3.msra.mxu0 %v557_v1  ;;  %v554_v7 = vld [vmem:[%s2743_s2] sm:$0xff]  ;;  %v551_v11 = vld [vmem:[%s2410_s26 + $0x8] sm:$0xff]  ;;  %v552_v13 = vld [vmem:[%s2410_s26 + $0x10] sm:$0xff]  ;;  %s2312_s15 = smov 96   ;;  %p2023_p6 = scmp.ne.s32.totalorder %s2401_s19, 1 }
  0x1a   : > { %2110 = vmatpush3.msra.mxu1 %v675_v2  ;;  %2097 = vmatprep.subr.mxu0 %v556_v3  ;;  %v672_v8 = vld [vmem:[%s2747_s6] sm:$0xff]  ;;  %v669_v12 = vld [vmem:[%s2415_s30 + $0x8] sm:$0xff]  ;;  %v2462_v14 = vld [vmem:[%s2744_s3 + $0x18] sm:$0xff] }
  0x1b   : > { %2111 = vmatprep.subr.mxu1 %v674_v4  ;;  %2098 = vmatpush3.msra.mxu0 %v556_v3  ;;  %v550_v9 = vld [vmem:[%s2410_s26] sm:$0xff]  ;;  %v670_v15 = vld [vmem:[%s2415_s30 + $0x10] sm:$0xff]  ;;  %v671_v18 = vld [vmem:[%s2415_s30 + $0x18] sm:$0xff] }
  0x1c   : > { %2112 = vmatpush3.msra.mxu1 %v674_v4  ;;  %2099 = vmatprep.subr.mxu0 %v555_v5  ;;  %v668_v10 = vld [vmem:[%s2415_s30] sm:$0xff]  ;;  %v2472_v17 = vld [vmem:[%s2744_s3 + $0x10] sm:$0xff]  ;;  %v553_v19 = vld [vmem:[%s2410_s26 + $0x18] sm:$0xff] }
  0x1d   : > { %2113 = vmatprep.subr.mxu1 %v673_v6  ;;  %2100 = vmatpush3.msra.mxu0 %v555_v5  ;;  %v2483_v20 = vld [vmem:[%s2748_s7 + $0x18] sm:$0xff]  ;;  %v2488_v21 = vld [vmem:[%s2744_s3 + $0x8] sm:$0xff]  ;;  %v2497_v22 = vld [vmem:[%s2748_s7 + $0x10] sm:$0xff] }
  0x1e   : > { %2114 = vmatpush3.msra.mxu1 %v673_v6  ;;  %2101 = vmatprep.subr.mxu0 %v554_v7  ;;  %v2502_v23 = vld [vmem:[%s2744_s3] sm:$0xff]  ;;  %v2513_v25 = vld [vmem:[%s2748_s7 + $0x8] sm:$0xff] }
  0x1f   : > { %2115 = vmatprep.subr.mxu1 %v672_v8  ;;  %2102 = vmatpush3.msra.mxu0 %v554_v7  ;;  %v2508_v24 = vld [vmem:[#allocation2] sm:$0xff]  ;;  %v2531_v28 = vld [vmem:[#allocation3] sm:$0xff] }
  0x20   : > { %2103 = vmatprep.mubr.msk.f32.mxu0 %vm565_vm1, %v550_v9  ;;  %2116 = vmatpush3.msra.mxu1 %v672_v8  ;;  %v2523_v26 = vld [vmem:[%s2748_s7] sm:$0xff] }
  0x21   : > { %2117 = vmatprep.mubr.msk.f32.mxu1 %vm565_vm1, %v668_v10  ;;  %2104 = vmatmul.mubr.msk.f32.vlgmr.msra.gmra.mxu0 %vm565_vm1, %v551_v11  ;;  %v2001_v27 = vld [vmem:[%s2746_s5] ss:$0 sm:$0xff] }
  0x22   : > { %2118 = vmatmul.mubr.msk.f32.vlgmr.msra.gmra.mxu1 %vm565_vm1, %v669_v12  ;;  %2123 = vmatprep.subr.mxu0 %v2308_v16  ;;  %v2004_v29 = vld [vmem:[%s2750_s9] ss:$0 sm:$0xff] }
  0x23   : > { %2106 = vmatprep.mubr.msk.f32.mxu0 %vm565_vm1, %v552_v13  ;;  %2124 = vmatpush3.msra.mxu0 %v2462_v14  ;;  %v1989_v30 = vld [vmem:[%s2745_s4] ss:$0 sm:$0xff] }
  0x24   : > { %2120 = vmatprep.mubr.msk.f32.mxu1 %vm565_vm1, %v670_v15  ;;  %2125 = vmatprep.subr.mxu0 %v2308_v16  ;;  %v1994_v31 = vld [vmem:[%s2749_s8] ss:$0 sm:$0xff] }
  0x25   : > { %2134 = vmatprep.subr.mxu1 %v2308_v16  ;;  %2126 = vmatpush3.msra.mxu0 %v2472_v17 }
  0x26   : > { %2121 = vmatmul.mubr.msk.f32.gmra.mxu1 %vm565_vm1, %v671_v18  ;;  %2107 = vmatmul.mubr.msk.f32.gmra.mxu0 %vm565_vm1, %v553_v19 }
  0x27   : > { %2127 = vmatprep.subr.mxu0 %v2308_v16  ;;  %2135 = vmatpush3.msra.mxu1 %v2483_v20 }
  0x28   : > { %2128 = vmatpush3.msra.mxu0 %v2488_v21  ;;  %2136 = vmatprep.subr.mxu1 %v2308_v16 }
  0x29   : > { %2129 = vmatprep.subr.mxu0 %v2308_v16  ;;  %2137 = vmatpush3.msra.mxu1 %v2497_v22 }
  0x2a   : > { %2130 = vmatpush3.msra.mxu0 %v2502_v23  ;;  %2131 = vmatprep.mubr.msk.f32.mxu0 %vm2309_vm2, %v2308_v16 }
  0x2b   : > { %2138 = vmatprep.subr.mxu1 %v2308_v16  ;;  %2132 = vmatmul.mubr.msk.f32.vlgmr.msra.gmra.mxu0 %vm565_vm1, %v2508_v24 }
  0x2c   : > { %2139 = vmatpush3.msra.mxu1 %v2513_v25  ;;  %2142 = vmatprep.mubr.msk.f32.mxu1 %vm2309_vm2, %v2308_v16 }
  0x2d   : > { %2140 = vmatprep.subr.mxu1 %v2308_v16  ;;  %878 = vrot.lane.b32.xlu0 %v2001_v27, %s2310_s21 }
  0x2e   : > { %2141 = vmatpush3.msra.mxu1 %v2523_v26  ;;  %2145 = vmatprep.subr.mxu0 %v2308_v16 }
  0x2f   : > { %2143 = vmatmul.mubr.msk.f32.vlgmr.msra.gmra.mxu1 %vm565_vm1, %v2531_v28  ;;  %2146 = vmatpush3.msra.mxu0 %v2462_v14 }
  0x30   : > { %2156 = vmatprep.subr.mxu1 %v2308_v16  ;;  %2147 = vmatprep.subr.mxu0 %v2308_v16 }
  0x31   : > { %2157 = vmatpush3.msra.mxu1 %v2483_v20  ;;  %995 = vrot.lane.b32.xlu0 %v2004_v29, %s2310_s21 }
  0x32   : > { %2148 = vmatpush3.msra.mxu0 %v2472_v17  ;;  %2158 = vmatprep.subr.mxu1 %v2308_v16 }
  0x33   : > { %2149 = vmatprep.subr.mxu0 %v2308_v16  ;;  %2153 = vmatprep.mubr.msk.f32.mxu0 %vm2309_vm2, %v2308_v16 }
  0x34   : > { %2150 = vmatpush3.msra.mxu0 %v2488_v21  ;;  %2159 = vmatpush3.msra.mxu1 %v2497_v22 }
  0x35   : > { %2151 = vmatprep.subr.mxu0 %v2308_v16  ;;  %2160 = vmatprep.subr.mxu1 %v2308_v16 }
  0x36   : > { %2152 = vmatpush3.msra.mxu0 %v2502_v23  ;;  %2161 = vmatpush3.msra.mxu1 %v2513_v25 }
  0x37   : > { %2164 = vmatprep.mubr.msk.f32.mxu1 %vm2309_vm2, %v2308_v16  ;;  %2162 = vmatprep.subr.mxu1 %v2308_v16 }
  0x38   : > { %2167 = vmatprep.subr.mxu0 %v2308_v16  ;;  %2163 = vmatpush3.msra.mxu1 %v2523_v26 }
  0x39   : > { %2178 = vmatprep.subr.mxu1 %v2308_v16 }
  0x9f   : > { %v2576_v43 = vpop.permute.xlu0 %878 }
  0xa3   : > { %v2583_v51 = vpop.permute.xlu0 %995 }
  0xe1   : > { %v2105_v32 = vpop.f32.mrf.mxu0 }
  0xe2   : > { %v2119_v33 = vpop.f32.mrf.mxu1  ;;  %v650_v34 = vadd.f32 %v2105_v32, %v1989_v30 }
  0xe3   : > { %v767_v35 = vadd.f32 %v2119_v33, %v1994_v31  ;;  %v644_v36 = vpop.f32.mrf.mxu0 }
  0xe4   : > { %v761_v37 = vpop.f32.mrf.mxu1  ;;  %665 = vst.msk [vmem:[#allocation4 + $0x8] sm:$0xff] %vm663_vm3, %v650_v34  ;;  %v645_v38 = vadd.f32 %v1989_v30, %v644_v36 }
  0xe5   : > { %781 = vst.msk [vmem:[#allocation5 + $0x8] sm:$0xff] %vm663_vm3, %v767_v35  ;;  %v762_v39 = vadd.f32 %v1994_v31, %v761_v37 }
  0xe6   : > { %v2122_v40 = vpop.f32.mrf.mxu1  ;;  %664 = vst.msk [vmem:[#allocation4] sm:$0xff] %vm663_vm3, %v645_v38  ;;  %v2108_v41 = vpop.f32.mrf.mxu0 }
  0xe7   : > { %780 = vst.msk [vmem:[#allocation5] sm:$0xff] %vm663_vm3, %v762_v39  ;;  %v777_v42 = vadd.f32 %v2122_v40, %v1994_v31  ;;  %v660_v44 = vadd.f32 %v2108_v41, %v1989_v30 }
  0xe8   : > { %v771_v45 = vpop.f32.mrf.mxu1  ;;  %v654_v46 = vpop.f32.mrf.mxu0 }
  0xe9   : > { %783 = vst.msk [vmem:[#allocation5 + $0x18] sm:$0xff] %vm663_vm3, %v777_v42  ;;  %v772_v47 = vadd.f32 %v1994_v31, %v771_v45  ;;  %667 = vst.msk [vmem:[#allocation4 + $0x18] sm:$0xff] %vm663_vm3, %v660_v44  ;;  %v655_v48 = vadd.f32 %v1989_v30, %v654_v46 }
  0xeb   : > { %782 = vst.msk [vmem:[#allocation5 + $0x10] sm:$0xff] %vm663_vm3, %v772_v47  ;;  %666 = vst.msk [vmem:[#allocation4 + $0x10] sm:$0xff] %vm663_vm3, %v655_v48  ;;  %v862_v49 = vpop.f32.mrf.mxu0  ;;  %v1033_v44 = vld [vmem:[#allocation4 + $0x8] sm:$0xff] }
  0xec   : > { %v881_v50 = vadd.f32 %v2576_v43, %v862_v49 }
  0xed   : > { %v2133_v52 = vpop.f32.mrf.mxu0  ;;  %v788_v56 = vld [vmem:[#allocation4] sm:$0xff] }
  0xee   : > { %883 = vrot.lane.b32.xlu1 %v881_v50, %s2310_s21  ;;  %v866_v57 = vadd.f32 %v862_v49, %v788_v56 }
  0xef   : > { %v979_v53 = vpop.f32.mrf.mxu1 }
  0xf0   : > { %v998_v54 = vadd.f32 %v2583_v51, %v979_v53  ;;  %v905_v58 = vld [vmem:[#allocation5 + $0x18] sm:$0xff]  ;;  %v2000_v59 = vmul.f32 -1.442695, %v866_v57 }
  0xf1   : > { %v2144_v55 = vpop.f32.mrf.mxu1  ;;  %v983_v60 = vadd.f32 %v979_v53, %v905_v58 }
  0xf2   : > { %1000 = vrot.lane.b32.xlu1 %v998_v54, %s2310_s21  ;;  %2249 = vpow2.f32 %v2000_v59  ;;  %v1138_v46 = vld [vmem:[#allocation5 + $0x10] sm:$0xff] }
  0xf3   : > { %v2003_v61 = vmul.f32 -1.442695, %v983_v60 }
  0xf5   : > { %2251 = vpow2.f32 %v2003_v61 }
  0xff   : > { %v2250_v62 = vpop.eup %2249 }
 0x100   : > { %v870_v63 = vadd.f32 1.0, %v2250_v62 }
 0x102   : > { %v2252_v0 = vpop.eup %2251  ;;  %2253 = vrcp.f32 %v870_v63 }
 0x103   : > { %v987_v1 = vadd.f32 1.0, %v2252_v0 }
 0x105   : > { %2255 = vrcp.f32 %v987_v1 }
 0x10f   : > { %v2254_v2 = vpop.eup %2253 }
 0x110   : > { %v893_v18 = vsub.f32 1.0, %v2254_v2 }
 0x112   : > { %v2256_v5 = vpop.eup %2255 }
 0x113   : > { %v1010_v30 = vsub.f32 1.0, %v2256_v5 }
 0x160   : > { %v884_v3 = vpop.permute.xlu1 %883 }
 0x161   : > { %v886_v4 = vmul.f32 %v2254_v2, %v884_v3 }
 0x163   : > { %888 = vrot.lane.b32.xlu0 %v886_v4, %s2310_s21 }
 0x164   : > { %v1001_v6 = vpop.permute.xlu1 %1000 }
 0x165   : > { %v1003_v7 = vmul.f32 %v2256_v5, %v1001_v6 }
 0x167   : > { %1005 = vrot.lane.b32.xlu1 %v1003_v7, %s2310_s21 }
 0x16b   : > { %899 = vrot.lane.b32.xlu1 %v2508_v24, %s2311_s28 }
 0x16f   : > { %1016 = vrot.lane.b32.xlu1 %v2531_v28, %s2311_s28 }
 0x1d5   : > { %v889_v8 = vpop.permute.xlu0 %888 }
 0x1d6   : > { %v891_v9 = vadd.f32 %v889_v8, %v788_v56 }
 0x1d8   : > { %2257 = vtanh.f32 %v891_v9 }
 0x1d9   : > { %v1006_v10 = vpop.permute.xlu1 %1005 }
 0x1da   : > { %v1008_v11 = vadd.f32 %v1006_v10, %v905_v58 }
 0x1dc   : > { %2259 = vtanh.f32 %v1008_v11 }
 0x1dd   : > { %v900_v15 = vpop.permute.xlu1 %899 }
 0x1de   : > { %v902_v24 = vmul.f32 %v2254_v2, %v900_v15 }
 0x1e1   : > { %v1017_v28 = vpop.permute.xlu1 %1016 }
 0x1e2   : > { %v1019_v32 = vmul.f32 %v2256_v5, %v1017_v28 }
 0x1e5   : > { %v2258_v12 = vpop.eup %2257 }
 0x1e6   : > { %895 = vrot.lane.b32.xlu0 %v2258_v12, %s2312_s15 }
 0x1e9   : > { %v2260_v13 = vpop.eup %2259 }
 0x1ea   : > { %1012 = vrot.lane.b32.xlu0 %v2260_v13, %s2312_s15 }
 0x258   : > { %v896_v19 = vpop.permute.xlu0 %895 }
 0x259   : > { %v898_v27 = vmul.f32 %v896_v19, %v893_v18  ;;  %v1255_v18 = vld [vmem:[#allocation4 + $0x10] sm:$0xff] }
 0x25b   : > { %v2594_v29 = vadd.f32 %v902_v24, %v898_v27  ;;  %v1360_v24 = vld [vmem:[#allocation5 + $0x8] sm:$0xff] }
 0x25c   : > { %v1013_v31 = vpop.permute.xlu0 %1012 }
 0x25d   : > { %v1015_v33 = vmul.f32 %v1013_v31, %v1010_v30  ;;  %1022 = vrot.lane.b32.xlu0 %v2594_v29, %s2312_s15 }
 0x25f   : > { %v2598_v34 = vadd.f32 %v1019_v32, %v1015_v33 }
 0x261   : > { %1027 = vrot.lane.b32.xlu1 %v2598_v34, %s2312_s15 }
 0x2cf   : > { %v1023_v35 = vpop.permute.xlu0 %1022 }
 0x2d0   : > { %1025 = vst.msk [vmem:[%s2420_s18] sm:$0xff] %vm565_vm1, %v1023_v35  ;;  %2154 = vmatmul.mubr.msk.f32.vlgmr.msra.gmra.mxu0 %vm565_vm1, %v1023_v35 }
 0x2d1   : > { %2168 = vmatpush3.msra.mxu0 %v2462_v14  ;;  %2175 = vmatprep.mubr.msk.f32.mxu0 %vm2309_vm2, %v2308_v16 }
 0x2d2   : > { %2169 = vmatprep.subr.mxu0 %v2308_v16 }
 0x2d3   : > { %v1028_v36 = vpop.permute.xlu1 %1027  ;;  %2170 = vmatpush3.msra.mxu0 %v2472_v17 }
 0x2d4   : > { %2005 = vst.msk [vmem:[%s2425_s20 + $0x18] sm:$0xff] %vm565_vm1, %v1028_v36  ;;  %2165 = vmatmul.mubr.msk.f32.vlgmr.msra.gmra.mxu1 %vm565_vm1, %v1028_v36  ;;  %2171 = vmatprep.subr.mxu0 %v2308_v16 }
 0x2d5   : > { %2172 = vmatpush3.msra.mxu0 %v2488_v21  ;;  %2179 = vmatpush3.msra.mxu1 %v2483_v20 }
 0x2d6   : > { %2173 = vmatprep.subr.mxu0 %v2308_v16  ;;  %2180 = vmatprep.subr.mxu1 %v2308_v16 }
 0x2d7   : > { %2174 = vmatpush3.msra.mxu0 %v2502_v23  ;;  %2181 = vmatpush3.msra.mxu1 %v2497_v22 }
 0x2d8   : > { %2182 = vmatprep.subr.mxu1 %v2308_v16  ;;  %2186 = vmatprep.mubr.msk.f32.mxu1 %vm2309_vm2, %v2308_v16 }
 0x2d9   : > { %2183 = vmatpush3.msra.mxu1 %v2513_v25  ;;  %2189 = vmatprep.subr.mxu0 %v2308_v16 }
 0x2da   : > { %2184 = vmatprep.subr.mxu1 %v2308_v16 }
 0x2db   : > { %2185 = vmatpush3.msra.mxu1 %v2523_v26 }
 0x2dc   : > { %2200 = vmatprep.subr.mxu1 %v2308_v16 }
 0x390   : > { %v1106_v37 = vpop.f32.mrf.mxu0 }
 0x391   : > { %v1117_v38 = vadd.f32 %v1106_v37, %v2576_v43  ;;  %v1110_v45 = vadd.f32 %v1106_v37, %v1033_v44 }
 0x392   : > { %v2155_v39 = vpop.f32.mrf.mxu0 }
 0x393   : > { %1119 = vrot.lane.b32.xlu0 %v1117_v38, %s2310_s21  ;;  %v2007_v47 = vmul.f32 -1.442695, %v1110_v45 }
 0x394   : > { %v1211_v40 = vpop.f32.mrf.mxu1 }
 0x395   : > { %v1222_v41 = vadd.f32 %v1211_v40, %v2583_v51  ;;  %v1215_v48 = vadd.f32 %v1211_v40, %v1138_v46  ;;  %2261 = vpow2.f32 %v2007_v47 }
 0x396   : > { %v2166_v42 = vpop.f32.mrf.mxu1 }
 0x397   : > { %1224 = vrot.lane.b32.xlu1 %v1222_v41, %s2310_s21  ;;  %v2009_v49 = vmul.f32 -1.442695, %v1215_v48 }
 0x399   : > { %2263 = vpow2.f32 %v2009_v49 }
 0x3a2   : > { %v2262_v50 = vpop.eup %2261 }
 0x3a3   : > { %v1114_v52 = vadd.f32 1.0, %v2262_v50 }
 0x3a5   : > { %2265 = vrcp.f32 %v1114_v52 }
 0x3a6   : > { %v2264_v53 = vpop.eup %2263 }
 0x3a7   : > { %v1219_v54 = vadd.f32 1.0, %v2264_v53 }
 0x3a9   : > { %2267 = vrcp.f32 %v1219_v54 }
 0x3b2   : > { %v2266_v55 = vpop.eup %2265 }
 0x3b3   : > { %v1129_v3 = vsub.f32 1.0, %v2266_v55  ;;  %v1135_v5 = vmul.f32 %v2266_v55, %v2594_v29 }
 0x3b6   : > { %v2268_v58 = vpop.eup %2267 }
 0x3b7   : > { %v1234_v8 = vsub.f32 1.0, %v2268_v58  ;;  %v1240_v10 = vmul.f32 %v2268_v58, %v2598_v34 }
 0x405   : > { %v1120_v56 = vpop.permute.xlu0 %1119 }
 0x406   : > { %v1122_v57 = vmul.f32 %v2266_v55, %v1120_v56 }
 0x408   : > { %1124 = vrot.lane.b32.xlu0 %v1122_v57, %s2310_s21 }
 0x409   : > { %v1225_v59 = vpop.permute.xlu1 %1224 }
 0x40a   : > { %v1227_v60 = vmul.f32 %v2268_v58, %v1225_v59 }
 0x40c   : > { %1229 = vrot.lane.b32.xlu1 %v1227_v60, %s2310_s21 }
 0x47a   : > { %v1125_v61 = vpop.permute.xlu0 %1124 }
 0x47b   : > { %v1127_v62 = vadd.f32 %v1125_v61, %v1033_v44 }
 0x47d   : > { %2269 = vtanh.f32 %v1127_v62 }
 0x47e   : > { %v1230_v63 = vpop.permute.xlu1 %1229 }
 0x47f   : > { %v1232_v0 = vadd.f32 %v1230_v63, %v1138_v46  ;;  %v1477_v63 = vld [vmem:[#allocation4 + $0x18] sm:$0xff] }
 0x481   : > { %2271 = vtanh.f32 %v1232_v0 }
 0x48a   : > { %v2270_v1 = vpop.eup %2269 }
 0x48b   : > { %1131 = vrot.lane.b32.xlu0 %v2270_v1, %s2312_s15  ;;  %v1581_v1 = vld [vmem:[#allocation5] sm:$0xff] }
 0x48e   : > { %v2272_v2 = vpop.eup %2271 }
 0x48f   : > { %1236 = vrot.lane.b32.xlu1 %v2272_v2, %s2312_s15 }
 0x4fd   : > { %v1132_v4 = vpop.permute.xlu0 %1131 }
 0x4fe   : > { %v1134_v6 = vmul.f32 %v1132_v4, %v1129_v3 }
 0x500   : > { %v2637_v7 = vadd.f32 %v1135_v5, %v1134_v6 }
 0x501   : > { %v1237_v9 = vpop.permute.xlu1 %1236 }
 0x502   : > { %v1239_v11 = vmul.f32 %v1237_v9, %v1234_v8  ;;  %1243 = vrot.lane.b32.xlu0 %v2637_v7, %s2312_s15 }
 0x504   : > { %v2642_v12 = vadd.f32 %v1240_v10, %v1239_v11 }
 0x506   : > { %1249 = vrot.lane.b32.xlu1 %v2642_v12, %s2312_s15 }
 0x574   : > { %v1244_v13 = vpop.permute.xlu0 %1243 }
 0x575   : > { %2010 = vst.msk [vmem:[%s2420_s18 + $0x8] sm:$0xff] %vm565_vm1, %v1244_v13  ;;  %2176 = vmatmul.mubr.msk.f32.vlgmr.msra.gmra.mxu0 %vm565_vm1, %v1244_v13 }
 0x576   : > { %2190 = vmatpush3.msra.mxu0 %v2462_v14  ;;  %2197 = vmatprep.mubr.msk.f32.mxu0 %vm2309_vm2, %v2308_v16 }
 0x577   : > { %2191 = vmatprep.subr.mxu0 %v2308_v16 }
 0x578   : > { %v1250_v15 = vpop.permute.xlu1 %1249  ;;  %2192 = vmatpush3.msra.mxu0 %v2472_v17 }
 0x579   : > { %2011 = vst.msk [vmem:[%s2425_s20 + $0x10] sm:$0xff] %vm565_vm1, %v1250_v15  ;;  %2187 = vmatmul.mubr.msk.f32.vlgmr.msra.gmra.mxu1 %vm565_vm1, %v1250_v15  ;;  %2193 = vmatprep.subr.mxu0 %v2308_v16 }
 0x57a   : > { %2194 = vmatpush3.msra.mxu0 %v2488_v21  ;;  %2201 = vmatpush3.msra.mxu1 %v2483_v20 }
 0x57b   : > { %2195 = vmatprep.subr.mxu0 %v2308_v16  ;;  %2202 = vmatprep.subr.mxu1 %v2308_v16 }
 0x57c   : > { %2196 = vmatpush3.msra.mxu0 %v2502_v23  ;;  %2203 = vmatpush3.msra.mxu1 %v2497_v22 }
 0x57d   : > { %2204 = vmatprep.subr.mxu1 %v2308_v16  ;;  %2208 = vmatprep.mubr.msk.f32.mxu1 %vm2309_vm2, %v2308_v16 }
 0x57e   : > { %2205 = vmatpush3.msra.mxu1 %v2513_v25 }
 0x57f   : > { %2206 = vmatprep.subr.mxu1 %v2308_v16 }
 0x580   : > { %2207 = vmatpush3.msra.mxu1 %v2523_v26 }
 0x635   : > { %v1328_v14 = vpop.f32.mrf.mxu0 }
 0x636   : > { %v1339_v17 = vadd.f32 %v1328_v14, %v2576_v43  ;;  %v1332_v19 = vadd.f32 %v1328_v14, %v1255_v18 }
 0x637   : > { %v2177_v20 = vpop.f32.mrf.mxu0 }
 0x638   : > { %1341 = vrot.lane.b32.xlu0 %v1339_v17, %s2310_s21  ;;  %v2013_v25 = vmul.f32 -1.442695, %v1332_v19 }
 0x639   : > { %v1433_v21 = vpop.f32.mrf.mxu1 }
 0x63a   : > { %v1444_v22 = vadd.f32 %v1433_v21, %v2583_v51  ;;  %v1437_v27 = vadd.f32 %v1433_v21, %v1360_v24  ;;  %2273 = vpow2.f32 %v2013_v25 }
 0x63b   : > { %v2188_v23 = vpop.f32.mrf.mxu1 }
 0x63c   : > { %1446 = vrot.lane.b32.xlu1 %v1444_v22, %s2310_s21  ;;  %v2015_v16 = vmul.f32 -1.442695, %v1437_v27 }
 0x63e   : > { %2275 = vpow2.f32 %v2015_v16 }
 0x647   : > { %v2274_v26 = vpop.eup %2273 }
 0x648   : > { %v1336_v28 = vadd.f32 1.0, %v2274_v26 }
 0x64a   : > { %2277 = vrcp.f32 %v1336_v28 }
 0x64b   : > { %v2276_v29 = vpop.eup %2275 }
 0x64c   : > { %v1441_v30 = vadd.f32 1.0, %v2276_v29 }
 0x64e   : > { %2279 = vrcp.f32 %v1441_v30 }
 0x657   : > { %v2278_v31 = vpop.eup %2277 }
 0x658   : > { %v1351_v44 = vsub.f32 1.0, %v2278_v31  ;;  %v1357_v46 = vmul.f32 %v2278_v31, %v2637_v7 }
 0x65b   : > { %v2280_v34 = vpop.eup %2279 }
 0x65c   : > { %v1456_v49 = vsub.f32 1.0, %v2280_v34  ;;  %v1462_v52 = vmul.f32 %v2280_v34, %v2642_v12 }
 0x6aa   : > { %v1342_v32 = vpop.permute.xlu0 %1341 }
 0x6ab   : > { %v1344_v33 = vmul.f32 %v2278_v31, %v1342_v32 }
 0x6ad   : > { %1346 = vrot.lane.b32.xlu0 %v1344_v33, %s2310_s21 }
 0x6ae   : > { %v1447_v35 = vpop.permute.xlu1 %1446 }
 0x6af   : > { %v1449_v36 = vmul.f32 %v2280_v34, %v1447_v35 }
 0x6b1   : > { %1451 = vrot.lane.b32.xlu1 %v1449_v36, %s2310_s21 }
 0x71f   : > { %v1347_v37 = vpop.permute.xlu0 %1346 }
 0x720   : > { %v1349_v38 = vadd.f32 %v1347_v37, %v1255_v18 }
 0x722   : > { %2281 = vtanh.f32 %v1349_v38 }
 0x723   : > { %v1452_v39 = vpop.permute.xlu1 %1451 }
 0x724   : > { %v1454_v40 = vadd.f32 %v1452_v39, %v1360_v24 }
 0x726   : > { %2283 = vtanh.f32 %v1454_v40 }
 0x72f   : > { %v2282_v41 = vpop.eup %2281 }
 0x730   : > { %1353 = vrot.lane.b32.xlu0 %v2282_v41, %s2312_s15 }
 0x733   : > { %v2284_v42 = vpop.eup %2283 }
 0x734   : > { %1458 = vrot.lane.b32.xlu1 %v2284_v42, %s2312_s15 }
 0x7a2   : > { %v1354_v45 = vpop.permute.xlu0 %1353 }
 0x7a3   : > { %v1356_v47 = vmul.f32 %v1354_v45, %v1351_v44 }
 0x7a5   : > { %v1358_v48 = vadd.f32 %v1357_v46, %v1356_v47 }
 0x7a6   : > { %v1459_v50 = vpop.permute.xlu1 %1458 }
 0x7a7   : > { %v1461_v53 = vmul.f32 %v1459_v50, %v1456_v49  ;;  %1465 = vrot.lane.b32.xlu0 %v1358_v48, %s2312_s15 }
 0x7a9   : > { %v1463_v54 = vadd.f32 %v1462_v52, %v1461_v53 }
 0x7ab   : > { %1471 = vrot.lane.b32.xlu1 %v1463_v54, %s2312_s15 }
 0x819   : > { %v1466_v55 = vpop.permute.xlu0 %1465 }
 0x81a   : > { %2016 = vst.msk [vmem:[%s2420_s18 + $0x10] sm:$0xff] %vm565_vm1, %v1466_v55  ;;  %2198 = vmatmul.mubr.msk.f32.vlgmr.msra.gmra.mxu0 %vm565_vm1, %v1466_v55 }
 0x81d   : > { %v1472_v56 = vpop.permute.xlu1 %1471 }
 0x81e   : > { %2017 = vst.msk [vmem:[%s2425_s20 + $0x8] sm:$0xff] %vm565_vm1, %v1472_v56  ;;  %2209 = vmatmul.mubr.msk.f32.vlgmr.msra.gmra.mxu1 %vm565_vm1, %v1472_v56 }
 0x8da   : > { %v1550_v57 = vpop.f32.mrf.mxu0 }
 0x8db   : > { %v1561_v58 = vadd.f32 %v1550_v57, %v2576_v43  ;;  %v1554_v0 = vadd.f32 %v1550_v57, %v1477_v63 }
 0x8dc   : > { %v2199_v59 = vpop.f32.mrf.mxu0 }
 0x8dd   : > { %1563 = vrot.lane.b32.xlu0 %v1561_v58, %s2310_s21  ;;  %v2019_v2 = vmul.f32 -1.442695, %v1554_v0 }
 0x8de   : > { %v1654_v60 = vpop.f32.mrf.mxu1 }
 0x8df   : > { %v1665_v61 = vadd.f32 %v1654_v60, %v2583_v51  ;;  %v1658_v3 = vadd.f32 %v1654_v60, %v1581_v1  ;;  %2285 = vpow2.f32 %v2019_v2 }
 0x8e0   : > { %v2210_v62 = vpop.f32.mrf.mxu1 }
 0x8e1   : > { %1667 = vrot.lane.b32.xlu1 %v1665_v61, %s2310_s21  ;;  %v2021_v4 = vmul.f32 -1.442695, %v1658_v3 }
 0x8e3   : > { %2287 = vpow2.f32 %v2021_v4 }
 0x8ec   : > { %v2286_v5 = vpop.eup %2285 }
 0x8ed   : > { %v1558_v6 = vadd.f32 1.0, %v2286_v5 }
 0x8ef   : > { %2289 = vrcp.f32 %v1558_v6 }
 0x8f0   : > { %v2288_v43 = vpop.eup %2287 }
 0x8f1   : > { %v1662_v7 = vadd.f32 1.0, %v2288_v43 }
 0x8f3   : > { %2291 = vrcp.f32 %v1662_v7 }
 0x8fc   : > { %v2290_v8 = vpop.eup %2289 }
 0x8fd   : > { %v1573_v22 = vsub.f32 1.0, %v2290_v8  ;;  %v1579_v18 = vmul.f32 %v2290_v8, %v1358_v48 }
 0x900   : > { %v2292_v10 = vpop.eup %2291 }
 0x901   : > { %v1677_v25 = vsub.f32 1.0, %v2292_v10  ;;  %v1683_v16 = vmul.f32 %v2292_v10, %v1463_v54 }
 0x94f   : > { %v1564_v9 = vpop.permute.xlu0 %1563 }
 0x950   : > { %v1566_v51 = vmul.f32 %v2290_v8, %v1564_v9 }
 0x952   : > { %1568 = vrot.lane.b32.xlu0 %v1566_v51, %s2310_s21 }
 0x953   : > { %v1668_v11 = vpop.permute.xlu1 %1667 }
 0x954   : > { %v1670_v12 = vmul.f32 %v2292_v10, %v1668_v11 }
 0x956   : > { %1672 = vrot.lane.b32.xlu1 %v1670_v12, %s2310_s21 }
 0x9c4   : > { %v1569_v13 = vpop.permute.xlu0 %1568 }
 0x9c5   : > { %v1571_v15 = vadd.f32 %v1569_v13, %v1477_v63 }
 0x9c7   : > { %2293 = vtanh.f32 %v1571_v15 }
 0x9c8   : > { %v1673_v14 = vpop.permute.xlu1 %1672 }
 0x9c9   : > { %v1675_v17 = vadd.f32 %v1673_v14, %v1581_v1 }
 0x9cb   : > { %2295 = vtanh.f32 %v1675_v17 }
 0x9d4   : > { %v2294_v20 = vpop.eup %2293 }
 0x9d5   : > { %1575 = vrot.lane.b32.xlu0 %v2294_v20, %s2312_s15 }
 0x9d8   : > { %v2296_v21 = vpop.eup %2295 }
 0x9d9   : > { %1679 = vrot.lane.b32.xlu1 %v2296_v21, %s2312_s15 }
 0xa47   : > { %v1576_v23 = vpop.permute.xlu0 %1575 }
 0xa48   : > { %v1578_v19 = vmul.f32 %v1576_v23, %v1573_v22 }
 0xa4a   : > { %v1580_v24 = vadd.f32 %v1579_v18, %v1578_v19 }
 0xa4b   : > { %v1680_v27 = vpop.permute.xlu1 %1679 }
 0xa4c   : > { %v1682_v26 = vmul.f32 %v1680_v27, %v1677_v25  ;;  %1686 = vrot.lane.b32.xlu0 %v1580_v24, %s2312_s15 }
 0xa4e   : > { %v1684_v28 = vadd.f32 %v1683_v16, %v1682_v26 }
 0xa50   : > { %1692 = vrot.lane.b32.xlu1 %v1684_v28, %s2312_s15 }
 0xabe   : > { %v1687_v29 = vpop.permute.xlu0 %1686 }
 0xabf   : > { %2022 = vst.msk [vmem:[%s2420_s18 + $0x18] sm:$0xff] %vm565_vm1, %v1687_v29  ;;  %1696 = vst.msk [vmem:[#allocation2] sm:$0xff] %vm565_vm1, %v1687_v29  ;;  %1701 = sbr.rel (%p2023_p6) target bundleno = 2978 (0xba2), region = 80  ;;  %s2760_s18 = sld [smem:[#allocation7_spill]] (!%p2023_p6) }
 0xac2   : > { %v1693_v30 = vpop.permute.xlu1 %1692 }
 0xac3   : > { %1695 = vst.msk [vmem:[%s2425_s20] sm:$0xff] %vm565_vm1, %v1693_v30  ;;  %1697 = vst.msk [vmem:[#allocation3] sm:$0xff] %vm565_vm1, %v1693_v30 }
 0xac4   : > { %v1709_v31 = vld [vmem:[%s2752_s11 + $0x18] sm:$0xff]  ;;  %v2313_v33 = vmov 0.0   ;;  %v1708_v34 = vld [vmem:[%s2752_s11 + $0x10] sm:$0xff]  ;;  %v1707_v36 = vld [vmem:[%s2752_s11 + $0x8] sm:$0xff]  ;;  %vm2314_vm4 = vmmov 0  }
 0xac5   : > { %v1705_v32 = vld [vmem:[%s2751_s10 + $0x18] sm:$0xff]  ;;  %2211 = vmatprep.subr.mxu0 %v2313_v33  ;;  %2222 = vmatprep.subr.mxu1 %v2313_v33  ;;  %v1704_v35 = vld [vmem:[%s2751_s10 + $0x10] sm:$0xff]  ;;  %v1703_v37 = vld [vmem:[%s2751_s10 + $0x8] sm:$0xff] }
 0xac6   : > { %2212 = vmatpush3.msra.mxu0 %v1709_v31  ;;  %2223 = vmatpush3.msra.mxu1 %v1705_v32  ;;  %v1706_v38 = vld [vmem:[%s2752_s11] sm:$0xff] }
 0xac7   : > { %2213 = vmatprep.subr.mxu0 %v2313_v33  ;;  %2224 = vmatprep.subr.mxu1 %v2313_v33  ;;  %v1702_v39 = vld [vmem:[%s2751_s10] sm:$0xff] }
 0xac8   : > { %2214 = vmatpush3.msra.mxu0 %v1708_v34  ;;  %2225 = vmatpush3.msra.mxu1 %v1704_v35  ;;  %v2026_v42 = vld [vmem:[%s2753_s12] ss:$0 sm:$0xff] }
 0xac9   : > { %2215 = vmatprep.subr.mxu0 %v2313_v33  ;;  %2226 = vmatprep.subr.mxu1 %v2313_v33 }
 0xaca   : > { %2216 = vmatpush3.msra.mxu0 %v1707_v36  ;;  %2227 = vmatpush3.msra.mxu1 %v1703_v37 }
 0xacb   : > { %2217 = vmatprep.subr.mxu0 %v2313_v33  ;;  %2228 = vmatprep.subr.mxu1 %v2313_v33 }
 0xacc   : > { %2218 = vmatpush3.msra.mxu0 %v1706_v38  ;;  %2219 = vmatprep.mubr.msk.f32.mxu0 %vm2314_vm4, %v2313_v33 }
 0xacd   : > { %2229 = vmatpush3.msra.mxu1 %v1702_v39  ;;  %2230 = vmatprep.mubr.msk.f32.mxu1 %vm2314_vm4, %v2313_v33 }
 0xace   : > { %2220 = vmatmul.mubr.msk.f32.vlgmr.msra.gmra.mxu0 %vm565_vm1, %v1693_v30  ;;  %2231 = vmatmul.mubr.msk.f32.vlgmr.msra.gmra.mxu1 %vm565_vm1, %v1687_v29 }
 0xb8e   : > { %v1778_v40 = vpop.f32.mrf.mxu0  ;;  %v1850_v41 = vpop.f32.mrf.mxu1 }
 0xb8f   : > { %v1851_v44 = vadd.f32 %v1850_v41, %v1778_v40 }
 0xb90   : > { %v2221_v45 = vpop.f32.mrf.mxu0  ;;  %v2232_v46 = vpop.f32.mrf.mxu1 }
 0xb91   : > { %v1861_v47 = vadd.f32 %v2026_v42, %v1851_v44 }
 0xb93   : > { %2297 = vtanh.f32 %v1861_v47 }
 0xba0   : > { %v2298_v48 = vpop.eup %2297 }
 0xba1   : > { %1863 = vst.msk [vmem:[%s2760_s18] sm:$0xff] %vm565_vm1, %v2298_v48 }
 0xba2 PF: > { %s2761_s21 = sld [smem:[#allocation6_spill]] }
 0xba8   : > { %s26_s18 = sadd.s32 1, %s2761_s21  }
 0xba9   : > { %p23_p7 = scmp.ge.s32.totalorder %s26_s18, 4  }
 0xbab   :  { %25 = sbr.rel (!%p23_p7) target bundleno = 2 (0x2), region = 145 }

</bundles_post_ra>
